<compile_context>
chip_gen: v7x
topology: tpu7x:2x2x1
jax: 0.10.0
libtpu: 0.0.40
codegen_flags: <defaults>
</compile_context>

<pallas_src>
import jax
import jax.numpy as jnp
from jax.experimental import pallas as pl
from jax.experimental.pallas import tpu as pltpu

N_KEYS = 500
D_KEY = 24
D_VAL = 4

N_PAD = 512          # keys padded to a multiple of 128 lanes
D_AUG = 32           # query/key depth: 24 real + 1 mask row + 7 zero pad (sublane-aligned)
D_OUT_PAD = 128      # lane-dense output block width
TQ = 128             # queries per grid step
NEG_BIG = -1e30      # additive mask for padded key lanes (finite: no inf-inf NaNs)


def net_kernel(q_ref, kt_ref, vt_ref, o_ref):
    # q_ref : (TQ, D_AUG)      queries, last real column is the constant 1.0
    # kt_ref: (D_AUG, N_PAD)   keys^T, row D_KEY = pad-lane mask (0 / -1e30)
    # vt_ref: (D_VAL, N_PAD)   values^T, pad lanes zero
    # o_ref : (TQ, D_OUT_PAD)  lane-dense output, first D_VAL lanes are real

    # Scores + pad-lane mask in one MXU matmul (mask rides on the constant-1
    # query column against the mask row of kt).
    s = jnp.dot(q_ref[...], kt_ref[...], preferred_element_type=jnp.float32)  # (TQ, N_PAD)

    # Numerically stable softmax over the key (lane) axis.  Padded lanes carry
    # -1e30 and underflow to exactly 0, so the denominator is exact.  Exact
    # division (no approx reciprocal) per correctness review.
    m = jnp.max(s, axis=-1, keepdims=True)
    e = jnp.exp(s - m)
    attn = e / jnp.sum(e, axis=-1, keepdims=True)                             # (TQ, N_PAD)

    # Second contraction (N = 4): VPU broadcast-multiply + XLU lane-reduce per
    # output column (MXU would be <2% utilized and only add MRF pop latency).
    # Columns are scattered into a lane-dense (TQ, 128) block -> one unmasked
    # store; the wrapper slices the first D_VAL lanes.
    lane = jax.lax.broadcasted_iota(jnp.int32, (o_ref.shape[0], D_OUT_PAD), 1)
    out = jnp.zeros(o_ref.shape, jnp.float32)
    for j in range(D_VAL):
        vj = vt_ref[j:j + 1, :]                                               # (1, N_PAD)
        col = jnp.sum(attn * vj, axis=-1, keepdims=True)                      # (TQ, 1)
        out = jnp.where(lane == j, jnp.tanh(col), out)
    o_ref[...] = out


def prepare_params(keys, values):
    """One-time (module __init__ equivalent) parameter prep: cast to f32,
    transpose, lane-pad to N_PAD, fold the pad-lane softmax mask into kt."""
    kt = jnp.asarray(keys, jnp.float32).T                                     # (24, 500)
    kt = jnp.pad(kt, ((0, 0), (0, N_PAD - N_KEYS)))                           # (24, 512)
    mask_row = jnp.where(jnp.arange(N_PAD) < N_KEYS, 0.0, NEG_BIG)
    mask_row = mask_row.astype(jnp.float32)[None, :]                          # (1, 512)
    zero_rows = jnp.zeros((D_AUG - D_KEY - 1, N_PAD), jnp.float32)            # (7, 512)
    kt_aug = jnp.concatenate([kt, mask_row, zero_rows], axis=0)               # (32, 512)

    vt = jnp.asarray(values, jnp.float32).T                                   # (4, 500)
    vt = jnp.pad(vt, ((0, 0), (0, N_PAD - N_KEYS)))                           # (4, 512)
    return kt_aug, vt


def net_forward(query, kt_aug, vt):
    """Forward pass.  query: (D_KEY,) (original module semantics) or a batch
    (B, D_KEY).  Returns (D_VAL,) or (B, D_VAL)."""
    single = query.ndim == 1
    q = jnp.asarray(query, jnp.float32).reshape(-1, D_KEY)
    b = q.shape[0]
    b_pad = ((b + TQ - 1) // TQ) * TQ

    # Constant-1 column (activates the kt mask row), pad to D_AUG cols / b_pad rows.
    q_aug = jnp.concatenate([q, jnp.ones((b, 1), jnp.float32)], axis=1)       # (b, 25)
    q_aug = jnp.pad(q_aug, ((0, b_pad - b), (0, D_AUG - D_KEY - 1)))          # (b_pad, 32)

    out = pl.pallas_call(
        net_kernel,
        out_shape=jax.ShapeDtypeStruct((b_pad, D_OUT_PAD), jnp.float32),
        grid=(b_pad // TQ,),
        in_specs=[
            pl.BlockSpec((TQ, D_AUG), lambda i: (i, 0)),        # queries: one tile per step
            pl.BlockSpec((D_AUG, N_PAD), lambda i: (0, 0)),     # keys^T: resident across grid
            pl.BlockSpec((D_VAL, N_PAD), lambda i: (0, 0)),     # values^T: resident across grid
        ],
        out_specs=pl.BlockSpec((TQ, D_OUT_PAD), lambda i: (i, 0)),
        compiler_params=pltpu.CompilerParams(
            dimension_semantics=("parallel",)),                 # v7x: shard batch over 2 TCs
    )(q_aug, kt_aug, vt)

    out = out[:b, :D_VAL]
    return out[0] if single else out


if __name__ == "__main__":
    key = jax.random.PRNGKey(0)
    k_keys, k_vals, k_query = jax.random.split(key, 3)

    # Deterministic "parameters" (torch.randn equivalents).
    keys = jax.random.normal(k_keys, (N_KEYS, D_KEY), dtype=jnp.float32)
    values = jax.random.normal(k_vals, (N_KEYS, D_VAL), dtype=jnp.float32)

    # Hoisted once (module __init__ equivalent).
    kt_aug, vt = prepare_params(keys, values)
    fwd = jax.jit(net_forward)

    # Batched path: B queries amortize launch + parameter DMA (B not a
    # multiple of TQ to exercise row padding; grid = 2 steps).
    B = 200
    queries = jax.random.normal(k_query, (B, D_KEY), dtype=jnp.float32)
    out_b = fwd(queries, kt_aug, vt)
    jax.block_until_ready(out_b)

    # Original single-query module semantics.
    out_1 = fwd(queries[0], kt_aug, vt)
    jax.block_until_ready(out_1)

    # Pure-JAX f32 reference at HIGHEST matmul precision.  With the exact
    # softmax division the only remaining deltas are f32 rounding / summation
    # order, so the tolerance is tight (the f64 module -> f32 compute cast is
    # a deliberate, documented approximation).
    hp = jax.lax.Precision.HIGHEST
    scores = jnp.einsum("bd,nd->bn", queries, keys, precision=hp)
    attn = jax.nn.softmax(scores, axis=-1)
    ref = jnp.tanh(jnp.einsum("bn,nd->bd", attn, values, precision=hp))

    assert out_b.shape == (B, D_VAL)
    assert out_1.shape == (D_VAL,)
    assert jnp.allclose(out_b, ref, atol=1e-4, rtol=1e-4), (out_b[:2], ref[:2])
    assert jnp.allclose(out_1, ref[0], atol=1e-4, rtol=1e-4), (out_1, ref[0])

    print("KERNEL_OK")
</pallas_src>

<mosaic_0001>
module attributes {stable_mosaic.version = 11 : i64} {
  func.func @net_kernel(%arg0: i32, %arg1: memref<128x32xf32, #tpu.memory_space<vmem>>, %arg2: memref<32x512xf32, #tpu.memory_space<vmem>>, %arg3: memref<4x512xf32, #tpu.memory_space<vmem>>, %arg4: memref<128x128xf32, #tpu.memory_space<vmem>>) attributes {dimension_semantics = [#tpu.dimension_semantics<parallel>], iteration_bounds = array<i64: 2>, scalar_prefetch = 0 : i64, scratch_operands = 0 : i64, tpu.core_type = #tpu.core_type<tc>, window_params = [{transform_indices = @transform_0, window_bounds = array<i64: 128, 32>}, {pipeline_mode = #tpu.pipeline_mode<synchronous>, transform_indices = @transform_1, window_bounds = array<i64: 32, 512>}, {pipeline_mode = #tpu.pipeline_mode<synchronous>, transform_indices = @transform_2, window_bounds = array<i64: 4, 512>}, {transform_indices = @transform_3, window_bounds = array<i64: 128, 128>}]} {
    %c0 = arith.constant 0 : index
    %c0_0 = arith.constant 0 : index
    %0 = vector.load %arg1[%c0, %c0_0] : memref<128x32xf32, #tpu.memory_space<vmem>>, vector<128x32xf32>
    %c0_1 = arith.constant 0 : index
    %c0_2 = arith.constant 0 : index
    %1 = vector.load %arg2[%c0_1, %c0_2] : memref<32x512xf32, #tpu.memory_space<vmem>>, vector<32x512xf32>
    %cst = arith.constant dense<0.000000e+00> : vector<128x512xf32>
    %2 = tpu.matmul %0, %1, %cst {dimension_numbers = #tpu.dot_dimension_numbers<[1], [0], [0], [1], [0, 0, 1, 1], [], []>} : vector<128x32xf32>, vector<32x512xf32>, vector<128x512xf32> -> vector<128x512xf32>
    %cst_3 = arith.constant dense<0xFF800000> : vector<128xf32>
    %3 = vector.multi_reduction <maximumf>, %2, %cst_3 [1] : vector<128x512xf32> to vector<128xf32>
    %4 = vector.shape_cast %3 : vector<128xf32> to vector<128x1xf32>
    %5 = vector.broadcast %4 : vector<128x1xf32> to vector<128x512xf32>
    %6 = arith.subf %2, %5 : vector<128x512xf32>
    %7 = math.exp %6 : vector<128x512xf32>
    %cst_4 = arith.constant dense<0.000000e+00> : vector<128xf32>
    %8 = vector.multi_reduction <add>, %7, %cst_4 [1] : vector<128x512xf32> to vector<128xf32>
    %9 = vector.shape_cast %8 : vector<128xf32> to vector<128x1xf32>
    %10 = vector.broadcast %9 : vector<128x1xf32> to vector<128x512xf32>
    %11 = arith.divf %7, %10 : vector<128x512xf32>
    %12 = tpu.iota {dimensions = array<i32: 1>} : vector<128x128xi32>
    %cst_5 = arith.constant 0.000000e+00 : f32
    %13 = vector.broadcast %cst_5 : f32 to vector<128x128xf32>
    %c0_6 = arith.constant 0 : index
    %c0_7 = arith.constant 0 : index
    %14 = vector.load %arg3[%c0_6, %c0_7] : memref<4x512xf32, #tpu.memory_space<vmem>>, vector<1x512xf32>
    %15 = vector.broadcast %14 : vector<1x512xf32> to vector<128x512xf32>
    %16 = arith.mulf %11, %15 : vector<128x512xf32>
    %cst_8 = arith.constant dense<0.000000e+00> : vector<128xf32>
    %17 = vector.multi_reduction <add>, %16, %cst_8 [1] : vector<128x512xf32> to vector<128xf32>
    %18 = vector.shape_cast %17 : vector<128xf32> to vector<128x1xf32>
    %c0_i32 = arith.constant 0 : i32
    %19 = vector.broadcast %c0_i32 : i32 to vector<128x128xi32>
    %20 = arith.cmpi eq, %12, %19 : vector<128x128xi32>
    %21 = math.tanh %18 : vector<128x1xf32>
    %22 = vector.shape_cast %21 : vector<128x1xf32> to vector<128x1xf32>
    %23 = vector.broadcast %22 : vector<128x1xf32> to vector<128x128xf32>
    %24 = arith.select %20, %23, %13 : vector<128x128xi1>, vector<128x128xf32>
    %c1 = arith.constant 1 : index
    %c0_9 = arith.constant 0 : index
    %25 = vector.load %arg3[%c1, %c0_9] : memref<4x512xf32, #tpu.memory_space<vmem>>, vector<1x512xf32>
    %26 = vector.broadcast %25 : vector<1x512xf32> to vector<128x512xf32>
    %27 = arith.mulf %11, %26 : vector<128x512xf32>
    %cst_10 = arith.constant dense<0.000000e+00> : vector<128xf32>
    %28 = vector.multi_reduction <add>, %27, %cst_10 [1] : vector<128x512xf32> to vector<128xf32>
    %29 = vector.shape_cast %28 : vector<128xf32> to vector<128x1xf32>
    %c1_i32 = arith.constant 1 : i32
    %30 = vector.broadcast %c1_i32 : i32 to vector<128x128xi32>
    %31 = arith.cmpi eq, %12, %30 : vector<128x128xi32>
    %32 = math.tanh %29 : vector<128x1xf32>
    %33 = vector.shape_cast %32 : vector<128x1xf32> to vector<128x1xf32>
    %34 = vector.broadcast %33 : vector<128x1xf32> to vector<128x128xf32>
    %35 = arith.select %31, %34, %24 : vector<128x128xi1>, vector<128x128xf32>
    %c2 = arith.constant 2 : index
    %c0_11 = arith.constant 0 : index
    %36 = vector.load %arg3[%c2, %c0_11] : memref<4x512xf32, #tpu.memory_space<vmem>>, vector<1x512xf32>
    %37 = vector.broadcast %36 : vector<1x512xf32> to vector<128x512xf32>
    %38 = arith.mulf %11, %37 : vector<128x512xf32>
    %cst_12 = arith.constant dense<0.000000e+00> : vector<128xf32>
    %39 = vector.multi_reduction <add>, %38, %cst_12 [1] : vector<128x512xf32> to vector<128xf32>
    %40 = vector.shape_cast %39 : vector<128xf32> to vector<128x1xf32>
    %c2_i32 = arith.constant 2 : i32
    %41 = vector.broadcast %c2_i32 : i32 to vector<128x128xi32>
    %42 = arith.cmpi eq, %12, %41 : vector<128x128xi32>
    %43 = math.tanh %40 : vector<128x1xf32>
    %44 = vector.shape_cast %43 : vector<128x1xf32> to vector<128x1xf32>
    %45 = vector.broadcast %44 : vector<128x1xf32> to vector<128x128xf32>
    %46 = arith.select %42, %45, %35 : vector<128x128xi1>, vector<128x128xf32>
    %c3 = arith.constant 3 : index
    %c0_13 = arith.constant 0 : index
    %47 = vector.load %arg3[%c3, %c0_13] : memref<4x512xf32, #tpu.memory_space<vmem>>, vector<1x512xf32>
    %48 = vector.broadcast %47 : vector<1x512xf32> to vector<128x512xf32>
    %49 = arith.mulf %11, %48 : vector<128x512xf32>
    %cst_14 = arith.constant dense<0.000000e+00> : vector<128xf32>
    %50 = vector.multi_reduction <add>, %49, %cst_14 [1] : vector<128x512xf32> to vector<128xf32>
    %51 = vector.shape_cast %50 : vector<128xf32> to vector<128x1xf32>
    %c3_i32 = arith.constant 3 : i32
    %52 = vector.broadcast %c3_i32 : i32 to vector<128x128xi32>
    %53 = arith.cmpi eq, %12, %52 : vector<128x128xi32>
    %54 = math.tanh %51 : vector<128x1xf32>
    %55 = vector.shape_cast %54 : vector<128x1xf32> to vector<128x1xf32>
    %56 = vector.broadcast %55 : vector<128x1xf32> to vector<128x128xf32>
    %57 = arith.select %53, %56, %46 : vector<128x128xi1>, vector<128x128xf32>
    %c0_15 = arith.constant 0 : index
    %c0_16 = arith.constant 0 : index
    %58 = vector.load %arg4[%c0_15, %c0_16] : memref<128x128xf32, #tpu.memory_space<vmem>>, vector<128x128xf32>
    tpu.vector_store %arg4[%c0_15, %c0_16], %57 {strides = array<i32>} : memref<128x128xf32, #tpu.memory_space<vmem>>, vector<128x128xf32>,
    return
  }
  func.func @transform_0(%arg0: i32) -> (i32, i32) {
    %c0_i32 = arith.constant 0 : i32
    %c0_i32_0 = arith.constant 0 : i32
    return %arg0, %c0_i32 : i32, i32
  }
  func.func @transform_1(%arg0: i32) -> (i32, i32) {
    %c0_i32 = arith.constant 0 : i32
    %c0_i32_0 = arith.constant 0 : i32
    %c0_i32_1 = arith.constant 0 : i32
    return %c0_i32, %c0_i32_0 : i32, i32
  }
  func.func @transform_2(%arg0: i32) -> (i32, i32) {
    %c0_i32 = arith.constant 0 : i32
    %c0_i32_0 = arith.constant 0 : i32
    %c0_i32_1 = arith.constant 0 : i32
    return %c0_i32, %c0_i32_0 : i32, i32
  }
  func.func @transform_3(%arg0: i32) -> (i32, i32) {
    %c0_i32 = arith.constant 0 : i32
    %c0_i32_0 = arith.constant 0 : i32
    return %arg0, %c0_i32 : i32, i32
  }
}

</mosaic_0001>

<bundles_post_ra>
// kernel: net_forward.1
= control target key start
LH: loop header
LB: loop body
LE: loop exit
PB: predicated region body
PF: predicated region fallthrough
CT: control target
= control target key end

     0   :  { %s2270_s12 = smov 0   ;;  %s3576_s0 = inlined_call_operand.vmem [shape: f32[256,32], index: 0, kind: input, shape index: {}]   ;;  %s3577_s1 = inlined_call_operand.vmem [shape: f32[32,512], index: 1, kind: input, shape index: {}]   ;;  %s3578_s2 = inlined_call_operand.vmem [shape: f32[4,512], index: 2, kind: input, shape index: {}]   ;;  %s3579_s3 = inlined_call_operand.vmem [shape: f32[256,128], index: 3, kind: output, shape index: {}]  }
   0x1 LB: > { %s1882_s13 = sadd.s32 4294967295, %s2247_s12   ;;  %p1886_p0 = scmp.ge.s32.totalorder %s2247_s12, 1  ;;  %s2247_s12 = sphi %s2270_s12, %s13_s12  }
   0x2   : > { %p138_p1 = scmp.lt.s32.totalorder %s2247_s12, 3 }
   0x4   : > { %p139_p2 = pnand %p1886_p0, %p138_p1 }
   0x6   : > { %142 = sbr.rel (%p139_p2) target bundleno = 858 (0x35a), region = 32 }
   0xd   : > { %v191_v0 = vld [vmem:[%s3577_s1 + $0x8] sm:$0xff]  ;;  %v190_v2 = vld [vmem:[%s3577_s1] sm:$0xff]  ;;  %s1887_s20 = sshll.u32 %s1882_s13, 4  ;;  %v193_v5 = vld [vmem:[%s3577_s1 + $0x18] sm:$0xff]  ;;  %v2249_v7 = vmov 0.0   ;;  %vm206_vm0 = vcmask 261120  }
   0xe   : > { %v195_v1 = vld [vmem:[%s3577_s1 + $0x28] sm:$0xff]  ;;  %v194_v4 = vld [vmem:[%s3577_s1 + $0x20] sm:$0xff]  ;;  %v197_v6 = vld [vmem:[%s3577_s1 + $0x38] sm:$0xff]  ;;  %319 = vmatprep.mubr.f32.mxu0 %v2249_v7  ;;  %p163_p3 = scmp.lt.s32.totalorder %s1887_s20, 31  ;;  %480 = vmatprep.mubr.f32.mxu1 %v2249_v7 }
   0xf   : > { %v1928_v3 = vpack.c.bf16 %v195_v1, %v191_v0  ;;  %v1930_v8 = vpack.c.bf16 %v194_v4, %v190_v2  ;;  %v1936_v9 = vpack.c.bf16 %v197_v6, %v193_v5  ;;  %v192_v10 = vld [vmem:[%s3577_s1 + $0x10] sm:$0xff]  ;;  %v199_v12 = vld [vmem:[%s3577_s1 + $0x48] sm:$0xff]  ;;  %v198_v15 = vld [vmem:[%s3577_s1 + $0x40] sm:$0xff] }
  0x10   : > { %v196_v11 = vld [vmem:[%s3577_s1 + $0x30] sm:$0xff]  ;;  %v203_v14 = vld [vmem:[%s3577_s1 + $0x68] sm:$0xff]  ;;  %v202_v16 = vld [vmem:[%s3577_s1 + $0x60] sm:$0xff]  ;;  %s3739_s20 = smov (!%p163_p3, %s1887_s20), 31 }
  0x11   : > { %1929 = vmatprep.subr.bf16.mxu0 %v1928_v3  ;;  %v1938_v13 = vpack.c.bf16 %v196_v11, %v192_v10  ;;  %1937 = vmatprep.subr.bf16.mxu1 %v1936_v9  ;;  %v1932_v17 = vpack.c.bf16 %v203_v14, %v199_v12  ;;  %v1934_v18 = vpack.c.bf16 %v202_v16, %v198_v15  ;;  %v201_v19 = vld [vmem:[%s3577_s1 + $0x58] sm:$0xff]  ;;  %v200_v21 = vld [vmem:[%s3577_s1 + $0x50] sm:$0xff]  ;;  %s1888_s22 = sshll.u32 %s3739_s20, 3 }
  0x12   : > { %1931 = vmatpush1.bf16.msra.mxu0 %v1930_v8  ;;  %v205_v20 = vld [vmem:[%s3577_s1 + $0x78] sm:$0xff]  ;;  %v204_v23 = vld [vmem:[%s3577_s1 + $0x70] sm:$0xff]  ;;  %s2336_s25 = scalar_lea.vmem %s3576_s0, %s1888_s22  ;;  %s3429_s9 = scalar_lea.vmem %s3579_s3, %s1888_s22 }
  0x13   : > { %1939 = vmatpush1.bf16.msra.mxu1 %v1938_v13  ;;  %v1940_v22 = vpack.c.bf16 %v205_v20, %v201_v19  ;;  %1933 = vmatprep.subr.bf16.mxu0 %v1932_v17  ;;  %v1942_v24 = vpack.c.bf16 %v204_v23, %v200_v21  ;;  %v174_v25 = vld [vmem:[%s2336_s25] sm:$0xff]  ;;  %v175_v26 = vld [vmem:[%s2336_s25 + $0x8] sm:$0xff]  ;;  %v176_v27 = vld [vmem:[%s2336_s25 + $0x10] sm:$0xff] }
  0x14   : > { %v177_v28 = vld [vmem:[%s2336_s25 + $0x18] sm:$0xff]  ;;  %v178_v29 = vld [vmem:[%s2336_s25 + $0x20] sm:$0xff]  ;;  %v179_v30 = vld [vmem:[%s2336_s25 + $0x28] sm:$0xff] }
  0x15   : > { %1941 = vmatprep.subr.bf16.mxu1 %v1940_v22  ;;  %v180_v31 = vld [vmem:[%s2336_s25 + $0x30] sm:$0xff]  ;;  %v181_v32 = vld [vmem:[%s2336_s25 + $0x38] sm:$0xff]  ;;  %v182_v33 = vld [vmem:[%s2336_s25 + $0x40] sm:$0xff] }
  0x16   : > { %1935 = vmatpush1.bf16.msra.mxu0 %v1934_v18  ;;  %v183_v34 = vld [vmem:[%s2336_s25 + $0x48] sm:$0xff]  ;;  %v184_v35 = vld [vmem:[%s2336_s25 + $0x50] sm:$0xff]  ;;  %v185_v36 = vld [vmem:[%s2336_s25 + $0x58] sm:$0xff] }
  0x17   : > { %1943 = vmatpush1.bf16.msra.mxu1 %v1942_v24  ;;  %v186_v37 = vld [vmem:[%s2336_s25 + $0x60] sm:$0xff]  ;;  %v187_v38 = vld [vmem:[%s2336_s25 + $0x68] sm:$0xff]  ;;  %v188_v39 = vld [vmem:[%s2336_s25 + $0x70] sm:$0xff] }
  0x18   : > { %v189_v40 = vld [vmem:[%s2336_s25 + $0x78] sm:$0xff] }
  0x19   : > { %1891 = vmatmul.mubr.msk.f32.vlgmr.msra.gmra.mrb[0].mxu0 %vm206_vm0, %v174_v25 }
  0x1a   : > { %1907 = vmatmul.mubr.msk.f32.vlgmr.msra.gmra.mrb[0].mxu1 %vm206_vm0, %v174_v25  ;;  %325 = vmatprep.mubr.f32.mxu0 %v2249_v7 }
  0x1b   : > { %486 = vmatprep.mubr.f32.mxu1 %v2249_v7 }
  0x1d   : > { %1892 = vmatmul.mubr.msk.f32.gmra.mrb[2].mxu0 %vm206_vm0, %v175_v26 }
  0x1e   : > { %1908 = vmatmul.mubr.msk.f32.gmra.mrb[2].mxu1 %vm206_vm0, %v175_v26  ;;  %331 = vmatprep.mubr.f32.mxu0 %v2249_v7 }
  0x1f   : > { %492 = vmatprep.mubr.f32.mxu1 %v2249_v7 }
  0x21   : > { %1893 = vmatmul.mubr.msk.f32.gmra.mrb[4].mxu0 %vm206_vm0, %v176_v27 }
  0x22   : > { %337 = vmatprep.mubr.f32.mxu0 %v2249_v7  ;;  %1909 = vmatmul.mubr.msk.f32.gmra.mrb[4].mxu1 %vm206_vm0, %v176_v27 }
  0x23   : > { %498 = vmatprep.mubr.f32.mxu1 %v2249_v7 }
  0x25   : > { %1894 = vmatmul.mubr.msk.f32.gmra.mrb[6].mxu0 %vm206_vm0, %v177_v28 }
  0x26   : > { %343 = vmatprep.mubr.f32.mxu0 %v2249_v7  ;;  %1910 = vmatmul.mubr.msk.f32.gmra.mrb[6].mxu1 %vm206_vm0, %v177_v28 }
  0x27   : > { %504 = vmatprep.mubr.f32.mxu1 %v2249_v7 }
  0x29   : > { %1895 = vmatmul.mubr.msk.f32.gmra.mrb[8].mxu0 %vm206_vm0, %v178_v29 }
  0x2a   : > { %349 = vmatprep.mubr.f32.mxu0 %v2249_v7  ;;  %1911 = vmatmul.mubr.msk.f32.gmra.mrb[8].mxu1 %vm206_vm0, %v178_v29 }
  0x2b   : > { %510 = vmatprep.mubr.f32.mxu1 %v2249_v7 }
  0x2d   : > { %1896 = vmatmul.mubr.msk.f32.gmra.mrb[10].mxu0 %vm206_vm0, %v179_v30 }
  0x2e   : > { %355 = vmatprep.mubr.f32.mxu0 %v2249_v7  ;;  %1912 = vmatmul.mubr.msk.f32.gmra.mrb[10].mxu1 %vm206_vm0, %v179_v30 }
  0x2f   : > { %516 = vmatprep.mubr.f32.mxu1 %v2249_v7 }
  0x31   : > { %1897 = vmatmul.mubr.msk.f32.gmra.mrb[12].mxu0 %vm206_vm0, %v180_v31 }
  0x32   : > { %361 = vmatprep.mubr.f32.mxu0 %v2249_v7  ;;  %1913 = vmatmul.mubr.msk.f32.gmra.mrb[12].mxu1 %vm206_vm0, %v180_v31 }
  0x33   : > { %522 = vmatprep.mubr.f32.mxu1 %v2249_v7 }
  0x35   : > { %1898 = vmatmul.mubr.msk.f32.gmra.mrb[14].mxu0 %vm206_vm0, %v181_v32 }
  0x36   : > { %367 = vmatprep.mubr.f32.mxu0 %v2249_v7  ;;  %1914 = vmatmul.mubr.msk.f32.gmra.mrb[14].mxu1 %vm206_vm0, %v181_v32 }
  0x37   : > { %528 = vmatprep.mubr.f32.mxu1 %v2249_v7 }
  0x39   : > { %1899 = vmatmul.mubr.msk.f32.gmra.mrb[16].mxu0 %vm206_vm0, %v182_v33 }
  0x3a   : > { %373 = vmatprep.mubr.f32.mxu0 %v2249_v7  ;;  %1915 = vmatmul.mubr.msk.f32.gmra.mrb[16].mxu1 %vm206_vm0, %v182_v33 }
  0x3b   : > { %534 = vmatprep.mubr.f32.mxu1 %v2249_v7 }
  0x3d   : > { %1900 = vmatmul.mubr.msk.f32.gmra.mrb[18].mxu0 %vm206_vm0, %v183_v34 }
  0x3e   : > { %379 = vmatprep.mubr.f32.mxu0 %v2249_v7  ;;  %1916 = vmatmul.mubr.msk.f32.gmra.mrb[18].mxu1 %vm206_vm0, %v183_v34 }
  0x3f   : > { %540 = vmatprep.mubr.f32.mxu1 %v2249_v7 }
  0x41   : > { %1901 = vmatmul.mubr.msk.f32.gmra.mrb[20].mxu0 %vm206_vm0, %v184_v35 }
  0x42   : > { %385 = vmatprep.mubr.f32.mxu0 %v2249_v7  ;;  %1917 = vmatmul.mubr.msk.f32.gmra.mrb[20].mxu1 %vm206_vm0, %v184_v35 }
  0x43   : > { %546 = vmatprep.mubr.f32.mxu1 %v2249_v7 }
  0x45   : > { %1902 = vmatmul.mubr.msk.f32.gmra.mrb[22].mxu0 %vm206_vm0, %v185_v36 }
  0x46   : > { %391 = vmatprep.mubr.f32.mxu0 %v2249_v7  ;;  %1918 = vmatmul.mubr.msk.f32.gmra.mrb[22].mxu1 %vm206_vm0, %v185_v36 }
  0x47   : > { %552 = vmatprep.mubr.f32.mxu1 %v2249_v7 }
  0x49   : > { %1903 = vmatmul.mubr.msk.f32.gmra.mrb[24].mxu0 %vm206_vm0, %v186_v37 }
  0x4a   : > { %397 = vmatprep.mubr.f32.mxu0 %v2249_v7  ;;  %1919 = vmatmul.mubr.msk.f32.gmra.mrb[24].mxu1 %vm206_vm0, %v186_v37 }
  0x4b   : > { %558 = vmatprep.mubr.f32.mxu1 %v2249_v7 }
  0x4d   : > { %1904 = vmatmul.mubr.msk.f32.gmra.mrb[26].mxu0 %vm206_vm0, %v187_v38 }
  0x4e   : > { %403 = vmatprep.mubr.f32.mxu0 %v2249_v7  ;;  %1920 = vmatmul.mubr.msk.f32.gmra.mrb[26].mxu1 %vm206_vm0, %v187_v38 }
  0x4f   : > { %564 = vmatprep.mubr.f32.mxu1 %v2249_v7 }
  0x51   : > { %1905 = vmatmul.mubr.msk.f32.gmra.mrb[28].mxu0 %vm206_vm0, %v188_v39 }
  0x52   : > { %409 = vmatprep.mubr.f32.mxu0 %v2249_v7  ;;  %1921 = vmatmul.mubr.msk.f32.gmra.mrb[28].mxu1 %vm206_vm0, %v188_v39 }
  0x53   : > { %570 = vmatprep.mubr.f32.mxu1 %v2249_v7 }
  0x55   : > { %1906 = vmatmul.mubr.msk.f32.gmra.mrb[30].mxu0 %vm206_vm0, %v189_v40 }
  0x56   : > { %1922 = vmatmul.mubr.msk.f32.gmra.mrb[30].mxu1 %vm206_vm0, %v189_v40 }
  0xec   : > { %v2416_v41 = vpop.f32.mrb[0].mxu0 }
  0xed   : > { %v2418_v42 = vpop.f32.mrb[1].mxu0  ;;  %v2420_v43 = vpop.f32.mrb[0].mxu1 }
  0xee   : > { %v577_v44 = vmax.f32 %v2416_v41, %v2418_v42  ;;  %v2424_v45 = vpop.f32.mrb[1].mxu1 }
  0xf0   : > { %v578_v46 = vmax.f32 %v577_v44, %v2420_v43  ;;  %v2427_v47 = vpop.f32.mrb[2].mxu0 }
  0xf1   : > { %v2429_v48 = vpop.f32.mrb[3].mxu0  ;;  %v2431_v49 = vpop.f32.mrb[2].mxu1 }
  0xf2   : > { %v582_v50 = vmax.f32 %v2427_v47, %v2429_v48  ;;  %v2435_v51 = vpop.f32.mrb[3].mxu1  ;;  %v579_v52 = vmax.f32 %v578_v46, %v2424_v45 }
  0xf4   : > { %v583_v53 = vmax.f32 %v582_v50, %v2431_v49  ;;  %580 = vmax.xlane.f32.xlu0 %v579_v52  ;;  %v2439_v54 = vpop.f32.mrb[4].mxu0 }
  0xf5   : > { %v2441_v55 = vpop.f32.mrb[5].mxu0  ;;  %v2443_v56 = vpop.f32.mrb[4].mxu1 }
  0xf6   : > { %v587_v57 = vmax.f32 %v2439_v54, %v2441_v55  ;;  %v584_v58 = vmax.f32 %v583_v53, %v2435_v51  ;;  %v2448_v59 = vpop.f32.mrb[5].mxu1 }
  0xf8   : > { %v588_v60 = vmax.f32 %v587_v57, %v2443_v56  ;;  %585 = vmax.xlane.f32.xlu0 %v584_v58  ;;  %v2451_v61 = vpop.f32.mrb[6].mxu0 }
  0xf9   : > { %v2453_v62 = vpop.f32.mrb[7].mxu0  ;;  %v2455_v63 = vpop.f32.mrb[6].mxu1 }
  0xfa   : > { %v592_v0 = vmax.f32 %v2451_v61, %v2453_v62  ;;  %v589_v1 = vmax.f32 %v588_v60, %v2448_v59  ;;  %v2460_v2 = vpop.f32.mrb[7].mxu1 }
  0xfc   : > { %v593_v3 = vmax.f32 %v592_v0, %v2455_v63  ;;  %590 = vmax.xlane.f32.xlu1 %v589_v1  ;;  %v2463_v4 = vpop.f32.mrb[8].mxu0 }
  0xfd   : > { %v2465_v5 = vpop.f32.mrb[9].mxu0  ;;  %v2467_v6 = vpop.f32.mrb[8].mxu1 }
  0xfe   : > { %v597_v7 = vmax.f32 %v2463_v4, %v2465_v5  ;;  %v594_v8 = vmax.f32 %v593_v3, %v2460_v2  ;;  %v2472_v9 = vpop.f32.mrb[9].mxu1 }
 0x100   : > { %v598_v10 = vmax.f32 %v597_v7, %v2467_v6  ;;  %595 = vmax.xlane.f32.xlu1 %v594_v8  ;;  %v2475_v11 = vpop.f32.mrb[10].mxu0 }
 0x101   : > { %v2477_v12 = vpop.f32.mrb[11].mxu0  ;;  %v2479_v13 = vpop.f32.mrb[10].mxu1 }
 0x102   : > { %v602_v14 = vmax.f32 %v2475_v11, %v2477_v12  ;;  %v599_v15 = vmax.f32 %v598_v10, %v2472_v9  ;;  %v2484_v16 = vpop.f32.mrb[11].mxu1 }
 0x104   : > { %v603_v17 = vmax.f32 %v602_v14, %v2479_v13  ;;  %600 = vmax.xlane.f32.xlu0 %v599_v15  ;;  %v2487_v18 = vpop.f32.mrb[12].mxu0 }
 0x105   : > { %v2489_v19 = vpop.f32.mrb[13].mxu0  ;;  %v2491_v20 = vpop.f32.mrb[12].mxu1 }
 0x106   : > { %v607_v21 = vmax.f32 %v2487_v18, %v2489_v19  ;;  %v604_v22 = vmax.f32 %v603_v17, %v2484_v16  ;;  %v2496_v23 = vpop.f32.mrb[13].mxu1 }
 0x108   : > { %v608_v24 = vmax.f32 %v607_v21, %v2491_v20  ;;  %605 = vmax.xlane.f32.xlu1 %v604_v22  ;;  %v2499_v25 = vpop.f32.mrb[14].mxu0 }
 0x109   : > { %v2501_v26 = vpop.f32.mrb[15].mxu0  ;;  %v2503_v27 = vpop.f32.mrb[14].mxu1 }
 0x10a   : > { %v612_v28 = vmax.f32 %v2499_v25, %v2501_v26  ;;  %v609_v29 = vmax.f32 %v608_v24, %v2496_v23  ;;  %v2508_v30 = vpop.f32.mrb[15].mxu1 }
 0x10c   : > { %v613_v31 = vmax.f32 %v612_v28, %v2503_v27  ;;  %610 = vmax.xlane.f32.xlu0 %v609_v29  ;;  %v2511_v32 = vpop.f32.mrb[16].mxu0 }
 0x10d   : > { %v2513_v33 = vpop.f32.mrb[17].mxu0  ;;  %v2515_v34 = vpop.f32.mrb[16].mxu1 }
 0x10e   : > { %v617_v35 = vmax.f32 %v2511_v32, %v2513_v33  ;;  %v614_v36 = vmax.f32 %v613_v31, %v2508_v30  ;;  %v2520_v37 = vpop.f32.mrb[17].mxu1 }
 0x110   : > { %v618_v38 = vmax.f32 %v617_v35, %v2515_v34  ;;  %615 = vmax.xlane.f32.xlu1 %v614_v36  ;;  %v2523_v39 = vpop.f32.mrb[18].mxu0 }
 0x111   : > { %v2525_v40 = vpop.f32.mrb[19].mxu0  ;;  %v2527_v44 = vpop.f32.mrb[18].mxu1 }
 0x112   : > { %v622_v46 = vmax.f32 %v2523_v39, %v2525_v40  ;;  %v619_v50 = vmax.f32 %v618_v38, %v2520_v37  ;;  %v2532_v52 = vpop.f32.mrb[19].mxu1 }
 0x114   : > { %v623_v53 = vmax.f32 %v622_v46, %v2527_v44  ;;  %620 = vmax.xlane.f32.xlu0 %v619_v50  ;;  %v2535_v57 = vpop.f32.mrb[20].mxu0 }
 0x115   : > { %v2537_v58 = vpop.f32.mrb[21].mxu0  ;;  %v2539_v60 = vpop.f32.mrb[20].mxu1 }
 0x116   : > { %v627_v0 = vmax.f32 %v2535_v57, %v2537_v58  ;;  %v624_v1 = vmax.f32 %v623_v53, %v2532_v52  ;;  %v2544_v3 = vpop.f32.mrb[21].mxu1 }
 0x118   : > { %v628_v7 = vmax.f32 %v627_v0, %v2539_v60  ;;  %625 = vmax.xlane.f32.xlu1 %v624_v1  ;;  %v2547_v8 = vpop.f32.mrb[22].mxu0 }
 0x119   : > { %v2549_v10 = vpop.f32.mrb[23].mxu0  ;;  %v2551_v14 = vpop.f32.mrb[22].mxu1 }
 0x11a   : > { %v632_v15 = vmax.f32 %v2547_v8, %v2549_v10  ;;  %v629_v17 = vmax.f32 %v628_v7, %v2544_v3  ;;  %v2556_v21 = vpop.f32.mrb[23].mxu1 }
 0x11c   : > { %v633_v22 = vmax.f32 %v632_v15, %v2551_v14  ;;  %630 = vmax.xlane.f32.xlu0 %v629_v17  ;;  %v2559_v24 = vpop.f32.mrb[24].mxu0 }
 0x11d   : > { %3633 = vst [vmem:[#allocation2_spill] sm:$0xff] %v2559_v24  ;;  %v2561_v28 = vpop.f32.mrb[25].mxu0  ;;  %v2563_v29 = vpop.f32.mrb[24].mxu1 }
 0x11e   : > { %3634 = vst [vmem:[#allocation3_spill] sm:$0xff] %v2561_v28  ;;  %3635 = vst [vmem:[#allocation4_spill] sm:$0xff] %v2563_v29  ;;  %v637_v31 = vmax.f32 %v2559_v24, %v2561_v28  ;;  %v634_v35 = vmax.f32 %v633_v22, %v2556_v21  ;;  %v2568_v36 = vpop.f32.mrb[25].mxu1 }
 0x11f   : > { %3636 = vst [vmem:[#allocation5_spill] sm:$0xff] %v2568_v36 }
 0x120   : > { %v638_v38 = vmax.f32 %v637_v31, %v2563_v29  ;;  %635 = vmax.xlane.f32.xlu1 %v634_v35  ;;  %v2571_v46 = vpop.f32.mrb[26].mxu0 }
 0x121   : > { %3637 = vst [vmem:[#allocation6_spill] sm:$0xff] %v2571_v46  ;;  %v2573_v50 = vpop.f32.mrb[27].mxu0  ;;  %v2575_v53 = vpop.f32.mrb[26].mxu1 }
 0x122   : > { %3638 = vst [vmem:[#allocation7_spill] sm:$0xff] %v2573_v50  ;;  %3639 = vst [vmem:[#allocation8_spill] sm:$0xff] %v2575_v53  ;;  %v642_v0 = vmax.f32 %v2571_v46, %v2573_v50  ;;  %v639_v1 = vmax.f32 %v638_v38, %v2568_v36  ;;  %v2580_v7 = vpop.f32.mrb[27].mxu1 }
 0x123   : > { %3640 = vst [vmem:[#allocation9_spill] sm:$0xff] %v2580_v7 }
 0x124   : > { %v643_v15 = vmax.f32 %v642_v0, %v2575_v53  ;;  %640 = vmax.xlane.f32.xlu0 %v639_v1  ;;  %v2583_v17 = vpop.f32.mrb[28].mxu0 }
 0x125   : > { %3641 = vst [vmem:[#allocation10_spill] sm:$0xff] %v2583_v17  ;;  %v2585_v22 = vpop.f32.mrb[29].mxu0  ;;  %v2587_v31 = vpop.f32.mrb[28].mxu1 }
 0x126   : > { %3642 = vst [vmem:[#allocation11_spill] sm:$0xff] %v2585_v22  ;;  %3643 = vst [vmem:[#allocation12_spill] sm:$0xff] %v2587_v31  ;;  %v647_v35 = vmax.f32 %v2583_v17, %v2585_v22  ;;  %v644_v29 = vmax.f32 %v643_v15, %v2580_v7  ;;  %v2592_v28 = vpop.f32.mrb[29].mxu1 }
 0x127   : > { %3644 = vst [vmem:[#allocation13_spill] sm:$0xff] %v2592_v28 }
 0x128   : > { %v648_v38 = vmax.f32 %v647_v35, %v2587_v31  ;;  %645 = vmax.xlane.f32.xlu1 %v644_v29  ;;  %v2595_v50 = vpop.f32.mrb[30].mxu0 }
 0x129   : > { %3645 = vst [vmem:[#allocation14_spill] sm:$0xff] %v2595_v50  ;;  %v2597_v0 = vpop.f32.mrb[31].mxu0  ;;  %v2599_v1 = vpop.f32.mrb[30].mxu1 }
 0x12a   : > { %3646 = vst [vmem:[#allocation15_spill] sm:$0xff] %v2597_v0  ;;  %v652_v53 = vmax.f32 %v2595_v50, %v2597_v0  ;;  %v649_v46 = vmax.f32 %v648_v38, %v2592_v28  ;;  %v2604_v36 = vpop.f32.mrb[31].mxu1 }
 0x12c   : > { %v653_v15 = vmax.f32 %v652_v53, %v2599_v1  ;;  %650 = vmax.xlane.f32.xlu0 %v649_v46 }
 0x12e   : > { %v654_v22 = vmax.f32 %v653_v15, %v2604_v36 }
 0x130   : > { %655 = vmax.xlane.f32.xlu1 %v654_v22 }
 0x181   : > { %v581_v29 = vpop.xlane.xlu0 %580 }
 0x182   : > { %v657_v35 = vsub.f32 %v2416_v41, %v581_v29  ;;  %v658_v31 = vsub.f32 %v2418_v42, %v581_v29  ;;  %v659_v17 = vsub.f32 %v2420_v43, %v581_v29  ;;  %v660_v7 = vsub.f32 %v2424_v45, %v581_v29 }
 0x184   : > { %v721_v0 = vmul.f32 1.442695, %v657_v35  ;;  %v723_v50 = vmul.f32 1.442695, %v658_v31  ;;  %v725_v38 = vmul.f32 1.442695, %v659_v17 }
 0x185   : > { %v727_v28 = vmul.f32 1.442695, %v660_v7  ;;  %v586_v24 = vpop.xlane.xlu0 %585 }
 0x186   : > { %1953 = vpow2.f32 %v721_v0  ;;  %v661_v46 = vsub.f32 %v2427_v47, %v586_v24  ;;  %v662_v53 = vsub.f32 %v2429_v48, %v586_v24  ;;  %v663_v22 = vsub.f32 %v2431_v49, %v586_v24 }
 0x187   : > { %1955 = vpow2.f32 %v723_v50  ;;  %v664_v41 = vsub.f32 %v2435_v51, %v586_v24 }
 0x188   : > { %1957 = vpow2.f32 %v725_v38  ;;  %v729_v42 = vmul.f32 1.442695, %v661_v46  ;;  %v731_v43 = vmul.f32 1.442695, %v662_v53  ;;  %v733_v15 = vmul.f32 1.442695, %v663_v22 }
 0x189   : > { %1959 = vpow2.f32 %v727_v28  ;;  %v735_v45 = vmul.f32 1.442695, %v664_v41  ;;  %v591_v31 = vpop.xlane.xlu1 %590 }
 0x18a   : > { %1961 = vpow2.f32 %v729_v42  ;;  %v665_v7 = vsub.f32 %v2439_v54, %v591_v31  ;;  %v666_v17 = vsub.f32 %v2441_v55, %v591_v31  ;;  %v667_v47 = vsub.f32 %v2443_v56, %v591_v31 }
 0x18b   : > { %1963 = vpow2.f32 %v731_v43  ;;  %v668_v48 = vsub.f32 %v2448_v59, %v591_v31 }
 0x18c   : > { %1965 = vpow2.f32 %v733_v15  ;;  %v737_v49 = vmul.f32 1.442695, %v665_v7  ;;  %v739_v51 = vmul.f32 1.442695, %v666_v17  ;;  %v741_v24 = vmul.f32 1.442695, %v667_v47 }
 0x18d   : > { %1967 = vpow2.f32 %v735_v45  ;;  %v743_v50 = vmul.f32 1.442695, %v668_v48  ;;  %v596_v0 = vpop.xlane.xlu1 %595 }
 0x18e   : > { %1969 = vpow2.f32 %v737_v49  ;;  %v669_v28 = vsub.f32 %v2451_v61, %v596_v0  ;;  %v670_v29 = vsub.f32 %v2453_v62, %v596_v0  ;;  %v671_v54 = vsub.f32 %v2455_v63, %v596_v0 }
 0x18f   : > { %1971 = vpow2.f32 %v739_v51  ;;  %v672_v55 = vsub.f32 %v2460_v2, %v596_v0 }
 0x190   : > { %v2624_v56 = vpop.eup %1953  ;;  %1973 = vpow2.f32 %v741_v24  ;;  %v745_v59 = vmul.f32 1.442695, %v669_v28  ;;  %v747_v35 = vmul.f32 1.442695, %v670_v29  ;;  %v749_v38 = vmul.f32 1.442695, %v671_v54 }
 0x191   : > { %v2626_v46 = vpop.eup %1955  ;;  %1975 = vpow2.f32 %v743_v50  ;;  %v751_v53 = vmul.f32 1.442695, %v672_v55  ;;  %v601_v22 = vpop.xlane.xlu0 %600 }
 0x192   : > { %v2628_v41 = vpop.eup %1957  ;;  %1977 = vpow2.f32 %v745_v59  ;;  %v673_v61 = vsub.f32 %v2463_v4, %v601_v22  ;;  %v674_v62 = vsub.f32 %v2465_v5, %v601_v22  ;;  %v675_v63 = vsub.f32 %v2467_v6, %v601_v22 }
 0x193   : > { %v2633_v2 = vpop.eup %1959  ;;  %1979 = vpow2.f32 %v747_v35  ;;  %v676_v42 = vsub.f32 %v2472_v9, %v601_v22  ;;  %v849_v43 = vadd.f32 %v2626_v46, %v2624_v56 }
 0x194   : > { %v2638_v15 = vpop.eup %1961  ;;  %1981 = vpow2.f32 %v749_v38  ;;  %v753_v45 = vmul.f32 1.442695, %v673_v61  ;;  %v755_v31 = vmul.f32 1.442695, %v674_v62  ;;  %v757_v7 = vmul.f32 1.442695, %v675_v63 }
 0x195   : > { %v2640_v17 = vpop.eup %1963  ;;  %1983 = vpow2.f32 %v751_v53  ;;  %v759_v4 = vmul.f32 1.442695, %v676_v42  ;;  %v606_v5 = vpop.xlane.xlu1 %605  ;;  %v850_v6 = vadd.f32 %v2628_v41, %v849_v43 }
 0x196   : > { %v2643_v47 = vpop.eup %1965  ;;  %1985 = vpow2.f32 %v753_v45  ;;  %v677_v9 = vsub.f32 %v2475_v11, %v606_v5  ;;  %v678_v48 = vsub.f32 %v2477_v12, %v606_v5  ;;  %v679_v49 = vsub.f32 %v2479_v13, %v606_v5 }
 0x197   : > { %v2648_v51 = vpop.eup %1967  ;;  %1987 = vpow2.f32 %v755_v31  ;;  %v680_v24 = vsub.f32 %v2484_v16, %v606_v5  ;;  %v851_v50 = vadd.f32 %v2633_v2, %v850_v6  ;;  %v854_v0 = vadd.f32 %v2640_v17, %v2638_v15 }
 0x198   : > { %v2654_v28 = vpop.eup %1969  ;;  %1989 = vpow2.f32 %v757_v7  ;;  %v761_v29 = vmul.f32 1.442695, %v677_v9  ;;  %v763_v54 = vmul.f32 1.442695, %v678_v48  ;;  %v765_v11 = vmul.f32 1.442695, %v679_v49 }
 0x199   : > { %v2656_v55 = vpop.eup %1971  ;;  %1991 = vpow2.f32 %v759_v4  ;;  %v767_v12 = vmul.f32 1.442695, %v680_v24  ;;  %852 = vadd.xlane.f32.xlu0 %v851_v50  ;;  %v611_v13 = vpop.xlane.xlu0 %610  ;;  %v855_v59 = vadd.f32 %v2643_v47, %v854_v0 }
 0x19a   : > { %v2659_v16 = vpop.eup %1973  ;;  %1993 = vpow2.f32 %v761_v29  ;;  %v681_v35 = vsub.f32 %v2487_v18, %v611_v13  ;;  %v682_v38 = vsub.f32 %v2489_v19, %v611_v13  ;;  %v683_v53 = vsub.f32 %v2491_v20, %v611_v13 }
 0x19b   : > { %v2664_v22 = vpop.eup %1975  ;;  %1995 = vpow2.f32 %v763_v54  ;;  %v684_v61 = vsub.f32 %v2496_v23, %v611_v13  ;;  %v856_v62 = vadd.f32 %v2648_v51, %v855_v59  ;;  %v859_v63 = vadd.f32 %v2656_v55, %v2654_v28 }
 0x19c   : > { %v2670_v42 = vpop.eup %1977  ;;  %1997 = vpow2.f32 %v765_v11  ;;  %v769_v43 = vmul.f32 1.442695, %v681_v35  ;;  %v771_v45 = vmul.f32 1.442695, %v682_v38  ;;  %v773_v18 = vmul.f32 1.442695, %v683_v53 }
 0x19d   : > { %v2672_v31 = vpop.eup %1979  ;;  %1999 = vpow2.f32 %v767_v12  ;;  %v775_v19 = vmul.f32 1.442695, %v684_v61  ;;  %857 = vadd.xlane.f32.xlu1 %v856_v62  ;;  %v616_v20 = vpop.xlane.xlu1 %615  ;;  %v860_v7 = vadd.f32 %v2659_v16, %v859_v63 }
 0x19e   : > { %v2675_v23 = vpop.eup %1981  ;;  %2001 = vpow2.f32 %v769_v43  ;;  %v685_v4 = vsub.f32 %v2499_v25, %v616_v20  ;;  %v686_v5 = vsub.f32 %v2501_v26, %v616_v20  ;;  %v687_v6 = vsub.f32 %v2503_v27, %v616_v20 }
 0x19f   : > { %v2680_v9 = vpop.eup %1983  ;;  %2003 = vpow2.f32 %v771_v45  ;;  %v688_v48 = vsub.f32 %v2508_v30, %v616_v20  ;;  %v861_v49 = vadd.f32 %v2664_v22, %v860_v7  ;;  %v864_v24 = vadd.f32 %v2672_v31, %v2670_v42 }
 0x1a0   : > { %v2686_v50 = vpop.eup %1985  ;;  %2005 = vpow2.f32 %v773_v18  ;;  %v777_v0 = vmul.f32 1.442695, %v685_v4  ;;  %v779_v29 = vmul.f32 1.442695, %v686_v5  ;;  %v781_v25 = vmul.f32 1.442695, %v687_v6 }
 0x1a1   : > { %v2688_v54 = vpop.eup %1987  ;;  %2007 = vpow2.f32 %v775_v19  ;;  %v783_v26 = vmul.f32 1.442695, %v688_v48  ;;  %862 = vadd.xlane.f32.xlu0 %v861_v49  ;;  %v621_v27 = vpop.xlane.xlu0 %620  ;;  %v865_v11 = vadd.f32 %v2675_v23, %v864_v24 }
 0x1a2   : > { %v2691_v30 = vpop.eup %1989  ;;  %2009 = vpow2.f32 %v777_v0  ;;  %v689_v12 = vsub.f32 %v2511_v32, %v621_v27  ;;  %v690_v13 = vsub.f32 %v2513_v33, %v621_v27  ;;  %v691_v59 = vsub.f32 %v2515_v34, %v621_v27 }
 0x1a3   : > { %v2696_v35 = vpop.eup %1991  ;;  %2011 = vpow2.f32 %v779_v29  ;;  %v692_v38 = vsub.f32 %v2520_v37, %v621_v27  ;;  %v866_v53 = vadd.f32 %v2680_v9, %v865_v11  ;;  %v869_v61 = vadd.f32 %v2688_v54, %v2686_v50 }
 0x1a4   : > { %v2702_v62 = vpop.eup %1993  ;;  %2013 = vpow2.f32 %v781_v25  ;;  %v785_v63 = vmul.f32 1.442695, %v689_v12  ;;  %v787_v43 = vmul.f32 1.442695, %v690_v13  ;;  %v789_v32 = vmul.f32 1.442695, %v691_v59 }
 0x1a5   : > { %v2704_v45 = vpop.eup %1995  ;;  %2015 = vpow2.f32 %v783_v26  ;;  %v791_v33 = vmul.f32 1.442695, %v692_v38  ;;  %867 = vadd.xlane.f32.xlu1 %v866_v53  ;;  %v626_v34 = vpop.xlane.xlu1 %625  ;;  %v870_v18 = vadd.f32 %v2691_v30, %v869_v61 }
 0x1a6   : > { %v2707_v37 = vpop.eup %1997  ;;  %2017 = vpow2.f32 %v785_v63  ;;  %v693_v19 = vsub.f32 %v2523_v39, %v626_v34  ;;  %v694_v20 = vsub.f32 %v2525_v40, %v626_v34  ;;  %v695_v7 = vsub.f32 %v2527_v44, %v626_v34 }
 0x1a7   : > { %v2712_v4 = vpop.eup %1999  ;;  %2019 = vpow2.f32 %v787_v43  ;;  %v696_v5 = vsub.f32 %v2532_v52, %v626_v34  ;;  %v871_v6 = vadd.f32 %v2696_v35, %v870_v18  ;;  %v874_v48 = vadd.f32 %v2704_v45, %v2702_v62 }
 0x1a8   : > { %v2718_v49 = vpop.eup %2001  ;;  %2021 = vpow2.f32 %v789_v32  ;;  %v793_v24 = vmul.f32 1.442695, %v693_v19  ;;  %v795_v0 = vmul.f32 1.442695, %v694_v20  ;;  %v797_v39 = vmul.f32 1.442695, %v695_v7 }
 0x1a9   : > { %v2720_v29 = vpop.eup %2003  ;;  %2023 = vpow2.f32 %v791_v33  ;;  %v799_v40 = vmul.f32 1.442695, %v696_v5  ;;  %872 = vadd.xlane.f32.xlu0 %v871_v6  ;;  %v631_v44 = vpop.xlane.xlu0 %630  ;;  %v875_v25 = vadd.f32 %v2707_v37, %v874_v48 }
 0x1aa   : > { %v2723_v52 = vpop.eup %2005  ;;  %2025 = vpow2.f32 %v793_v24  ;;  %v697_v26 = vsub.f32 %v2535_v57, %v631_v44  ;;  %v698_v27 = vsub.f32 %v2537_v58, %v631_v44  ;;  %v699_v11 = vsub.f32 %v2539_v60, %v631_v44 }
 0x1ab   : > { %3647 = vst [vmem:[#allocation16_spill] sm:$0xff] %v2723_v52  ;;  %v2728_v12 = vpop.eup %2007  ;;  %2027 = vpow2.f32 %v795_v0  ;;  %v700_v13 = vsub.f32 %v2544_v3, %v631_v44  ;;  %v876_v59 = vadd.f32 %v2712_v4, %v875_v25  ;;  %v879_v38 = vadd.f32 %v2720_v29, %v2718_v49  ;;  %v3657_v25 = vld [vmem:[#allocation3_spill] sm:$0xff] }
 0x1ac   : > { %3648 = vst [vmem:[#allocation17_spill] sm:$0xff] %v2728_v12  ;;  %v2734_v53 = vpop.eup %2009  ;;  %2029 = vpow2.f32 %v797_v39  ;;  %v801_v61 = vmul.f32 1.442695, %v697_v26  ;;  %v803_v63 = vmul.f32 1.442695, %v698_v27  ;;  %v3658_v27 = vld [vmem:[#allocation4_spill] sm:$0xff] }
 0x1ad   : > { %3649 = vst [vmem:[#allocation18_spill] sm:$0xff] %v2734_v53  ;;  %v805_v57 = vmul.f32 1.442695, %v699_v11  ;;  %v2736_v43 = vpop.eup %2011  ;;  %2031 = vpow2.f32 %v799_v40  ;;  %v807_v58 = vmul.f32 1.442695, %v700_v13  ;;  %877 = vadd.xlane.f32.xlu1 %v876_v59  ;;  %v636_v60 = vpop.xlane.xlu1 %635  ;;  %v880_v32 = vadd.f32 %v2723_v52, %v879_v38  ;;  %v3656_v40 = vld [vmem:[#allocation2_spill] sm:$0xff] }
 0x1ae   : > { %3650 = vst [vmem:[#allocation19_spill] sm:$0xff] %v2736_v43  ;;  %v2739_v3 = vpop.eup %2013  ;;  %2033 = vpow2.f32 %v801_v61  ;;  %v701_v33 = vsub.f32 %v2547_v8, %v636_v60  ;;  %v702_v34 = vsub.f32 %v2549_v10, %v636_v60  ;;  %v703_v18 = vsub.f32 %v2551_v14, %v636_v60  ;;  %v3660_v59 = vld [vmem:[#allocation5_spill] sm:$0xff] }
 0x1af   : > { %3651 = vst [vmem:[#allocation20_spill] sm:$0xff] %v2739_v3  ;;  %v2744_v19 = vpop.eup %2015  ;;  %2035 = vpow2.f32 %v803_v63  ;;  %v704_v20 = vsub.f32 %v2556_v21, %v636_v60  ;;  %v881_v7 = vadd.f32 %v2728_v12, %v880_v32  ;;  %v884_v5 = vadd.f32 %v2736_v43, %v2734_v53 }
 0x1b0   : > { %3652 = vst [vmem:[#allocation21_spill] sm:$0xff] %v2744_v19  ;;  %v2750_v6 = vpop.eup %2017  ;;  %2037 = vpow2.f32 %v805_v57  ;;  %v809_v48 = vmul.f32 1.442695, %v701_v33  ;;  %v811_v24 = vmul.f32 1.442695, %v702_v34 }
 0x1b1   : > { %3653 = vst [vmem:[#allocation22_spill] sm:$0xff] %v2750_v6  ;;  %v813_v8 = vmul.f32 1.442695, %v703_v18  ;;  %v2752_v0 = vpop.eup %2019  ;;  %2039 = vpow2.f32 %v807_v58  ;;  %v815_v10 = vmul.f32 1.442695, %v704_v20  ;;  %882 = vadd.xlane.f32.xlu0 %v881_v7  ;;  %v641_v14 = vpop.xlane.xlu0 %640  ;;  %v885_v39 = vadd.f32 %v2739_v3, %v884_v5  ;;  %v3664_v5 = vld [vmem:[#allocation6_spill] sm:$0xff] }
 0x1b2   : > { %3654 = vst [vmem:[#allocation23_spill] sm:$0xff] %v2752_v0  ;;  %v2755_v21 = vpop.eup %2021  ;;  %2041 = vpow2.f32 %v809_v48  ;;  %v705_v44 = vsub.f32 %v3656_v40, %v641_v14  ;;  %v706_v26 = vsub.f32 %v3657_v25, %v641_v14  ;;  %v707_v11 = vsub.f32 %v3658_v27, %v641_v14 }
 0x1b3   : > { %3655 = vst [vmem:[#allocation24_spill] sm:$0xff] %v2755_v21  ;;  %v2760_v13 = vpop.eup %2023  ;;  %2043 = vpow2.f32 %v811_v24  ;;  %v708_v38 = vsub.f32 %v3660_v59, %v641_v14  ;;  %v886_v61 = vadd.f32 %v2744_v19, %v885_v39  ;;  %v889_v63 = vadd.f32 %v2752_v0, %v2750_v6  ;;  %v3665_v24 = vld [vmem:[#allocation7_spill] sm:$0xff]  ;;  %v3666_v39 = vld [vmem:[#allocation8_spill] sm:$0xff] }
 0x1b4   : > { %3659 = vst [vmem:[#allocation2_spill] sm:$0xff] %v2760_v13  ;;  %v2766_v57 = vpop.eup %2025  ;;  %2045 = vpow2.f32 %v813_v8  ;;  %v817_v58 = vmul.f32 1.442695, %v705_v44  ;;  %v819_v60 = vmul.f32 1.442695, %v706_v26  ;;  %v3668_v44 = vld [vmem:[#allocation9_spill] sm:$0xff] }
 0x1b5   : > { %3661 = vst [vmem:[#allocation3_spill] sm:$0xff] %v2766_v57  ;;  %v821_v32 = vmul.f32 1.442695, %v707_v11  ;;  %v2768_v33 = vpop.eup %2027  ;;  %2047 = vpow2.f32 %v815_v10  ;;  %v823_v34 = vmul.f32 1.442695, %v708_v38  ;;  %887 = vadd.xlane.f32.xlu1 %v886_v61  ;;  %v646_v18 = vpop.xlane.xlu1 %645  ;;  %v890_v20 = vadd.f32 %v2755_v21, %v889_v63 }
 0x1b6   : > { %3662 = vst [vmem:[#allocation4_spill] sm:$0xff] %v2768_v33  ;;  %v2771_v7 = vpop.eup %2029  ;;  %2049 = vpow2.f32 %v817_v58  ;;  %v709_v48 = vsub.f32 %v3664_v5, %v646_v18  ;;  %v710_v14 = vsub.f32 %v3665_v24, %v646_v18  ;;  %v711_v8 = vsub.f32 %v3666_v39, %v646_v18  ;;  %v3673_v24 = vld [vmem:[#allocation11_spill] sm:$0xff] }
 0x1b7   : > { %3663 = vst [vmem:[#allocation5_spill] sm:$0xff] %v2771_v7  ;;  %v2776_v40 = vpop.eup %2031  ;;  %2051 = vpow2.f32 %v819_v60  ;;  %v712_v25 = vsub.f32 %v3668_v44, %v646_v18  ;;  %v891_v10 = vadd.f32 %v2760_v13, %v890_v20  ;;  %v894_v26 = vadd.f32 %v2768_v33, %v2766_v57  ;;  %v3672_v20 = vld [vmem:[#allocation10_spill] sm:$0xff]  ;;  %v3674_v44 = vld [vmem:[#allocation12_spill] sm:$0xff] }
 0x1b8   : > { %3667 = vst [vmem:[#allocation6_spill] sm:$0xff] %v2776_v40  ;;  %v2782_v27 = vpop.eup %2033  ;;  %2053 = vpow2.f32 %v821_v32  ;;  %v825_v11 = vmul.f32 1.442695, %v709_v48  ;;  %v827_v59 = vmul.f32 1.442695, %v710_v14  ;;  %v3676_v14 = vld [vmem:[#allocation13_spill] sm:$0xff] }
 0x1b9   : > { %3669 = vst [vmem:[#allocation7_spill] sm:$0xff] %v2782_v27  ;;  %v829_v38 = vmul.f32 1.442695, %v711_v8  ;;  %v2784_v61 = vpop.eup %2035  ;;  %2055 = vpow2.f32 %v823_v34  ;;  %v831_v63 = vmul.f32 1.442695, %v712_v25  ;;  %892 = vadd.xlane.f32.xlu0 %v891_v10  ;;  %v651_v58 = vpop.xlane.xlu0 %650  ;;  %v895_v60 = vadd.f32 %v2771_v7, %v894_v26 }
 0x1ba   : > { %3670 = vst [vmem:[#allocation8_spill] sm:$0xff] %v2784_v61  ;;  %v2787_v18 = vpop.eup %2037  ;;  %2057 = vpow2.f32 %v825_v11  ;;  %v713_v5 = vsub.f32 %v3672_v20, %v651_v58  ;;  %v714_v39 = vsub.f32 %v3673_v24, %v651_v58  ;;  %v715_v32 = vsub.f32 %v3674_v44, %v651_v58 }
 0x1bb   : > { %3671 = vst [vmem:[#allocation9_spill] sm:$0xff] %v2787_v18  ;;  %v2792_v48 = vpop.eup %2039  ;;  %2059 = vpow2.f32 %v827_v59  ;;  %v716_v8 = vsub.f32 %v3676_v14, %v651_v58  ;;  %v896_v34 = vadd.f32 %v2776_v40, %v895_v60  ;;  %v899_v25 = vadd.f32 %v2784_v61, %v2782_v27  ;;  %v3680_v60 = vld [vmem:[#allocation14_spill] sm:$0xff]  ;;  %v3681_v61 = vld [vmem:[#allocation15_spill] sm:$0xff] }
 0x1bc   : > { %3675 = vst [vmem:[#allocation10_spill] sm:$0xff] %v2792_v48  ;;  %v2798_v10 = vpop.eup %2041  ;;  %2061 = vpow2.f32 %v829_v38  ;;  %v833_v26 = vmul.f32 1.442695, %v713_v5  ;;  %v835_v11 = vmul.f32 1.442695, %v714_v39 }
 0x1bd   : > { %3677 = vst [vmem:[#allocation11_spill] sm:$0xff] %v2798_v10  ;;  %v837_v20 = vmul.f32 1.442695, %v715_v32  ;;  %v2800_v7 = vpop.eup %2043  ;;  %2063 = vpow2.f32 %v831_v63  ;;  %v839_v24 = vmul.f32 1.442695, %v716_v8  ;;  %897 = vadd.xlane.f32.xlu1 %v896_v34  ;;  %v656_v44 = vpop.xlane.xlu1 %655  ;;  %v900_v59 = vadd.f32 %v2787_v18, %v899_v25 }
 0x1be   : > { %3678 = vst [vmem:[#allocation12_spill] sm:$0xff] %v2800_v7  ;;  %v2803_v58 = vpop.eup %2045  ;;  %2065 = vpow2.f32 %v833_v26  ;;  %v717_v14 = vsub.f32 %v3680_v60, %v656_v44  ;;  %v718_v27 = vsub.f32 %v3681_v61, %v656_v44  ;;  %v719_v38 = vsub.f32 %v2599_v1, %v656_v44 }
 0x1bf   : > { %3679 = vst [vmem:[#allocation13_spill] sm:$0xff] %v2803_v58  ;;  %v2808_v5 = vpop.eup %2047  ;;  %2067 = vpow2.f32 %v835_v11  ;;  %v720_v39 = vsub.f32 %v2604_v36, %v656_v44  ;;  %v901_v63 = vadd.f32 %v2792_v48, %v900_v59  ;;  %v904_v32 = vadd.f32 %v2800_v7, %v2798_v10 }
 0x1c0   : > { %3682 = vst [vmem:[#allocation14_spill] sm:$0xff] %v2808_v5  ;;  %v2814_v8 = vpop.eup %2049  ;;  %2069 = vpow2.f32 %v837_v20  ;;  %v841_v34 = vmul.f32 1.442695, %v717_v14  ;;  %v843_v25 = vmul.f32 1.442695, %v718_v27 }
 0x1c1   : > { %3683 = vst [vmem:[#allocation15_spill] sm:$0xff] %v2814_v8  ;;  %v2816_v26 = vpop.eup %2051  ;;  %2071 = vpow2.f32 %v839_v24  ;;  %v845_v61 = vmul.f32 1.442695, %v719_v38  ;;  %902 = vadd.xlane.f32.xlu0 %v901_v63  ;;  %v905_v1 = vadd.f32 %v2803_v58, %v904_v32  ;;  %v847_v59 = vmul.f32 1.442695, %v720_v39 }
 0x1c2   : > { %3684 = vst [vmem:[#allocation25_spill] sm:$0xff] %v2816_v26  ;;  %v2819_v11 = vpop.eup %2053  ;;  %2073 = vpow2.f32 %v841_v34  ;;  %v909_v36 = vadd.f32 %v2816_v26, %v2814_v8 }
 0x1c3   : > { %3685 = vst [vmem:[#allocation26_spill] sm:$0xff] %v2819_v11  ;;  %v2823_v44 = vpop.eup %2055  ;;  %2075 = vpow2.f32 %v843_v25  ;;  %v906_v20 = vadd.f32 %v2808_v5, %v905_v1 }
 0x1c4   : > { %3686 = vst [vmem:[#allocation27_spill] sm:$0xff] %v2823_v44  ;;  %v2826_v27 = vpop.eup %2057  ;;  %v910_v24 = vadd.f32 %v2819_v11, %v909_v36  ;;  %2077 = vpow2.f32 %v845_v61 }
 0x1c5   : > { %3687 = vst [vmem:[#allocation28_spill] sm:$0xff] %v2826_v27  ;;  %v2829_v60 = vpop.eup %2059  ;;  %907 = vadd.xlane.f32.xlu1 %v906_v20  ;;  %2079 = vpow2.f32 %v847_v59 }
 0x1c6   : > { %3688 = vst [vmem:[#allocation29_spill] sm:$0xff] %v2829_v60  ;;  %v2831_v14 = vpop.eup %2061  ;;  %v911_v38 = vadd.f32 %v2823_v44, %v910_v24  ;;  %v914_v63 = vadd.f32 %v2829_v60, %v2826_v27 }
 0x1c7   : > { %3689 = vst [vmem:[#allocation30_spill] sm:$0xff] %v2831_v14  ;;  %v2836_v32 = vpop.eup %2063 }
 0x1c8   : > { %3690 = vst [vmem:[#allocation31_spill] sm:$0xff] %v2836_v32  ;;  %v2838_v39 = vpop.eup %2065  ;;  %912 = vadd.xlane.f32.xlu0 %v911_v38  ;;  %v915_v34 = vadd.f32 %v2831_v14, %v914_v63 }
 0x1c9   : > { %3691 = vst [vmem:[#allocation32_spill] sm:$0xff] %v2838_v39  ;;  %v2841_v25 = vpop.eup %2067 }
 0x1ca   : > { %3692 = vst [vmem:[#allocation33_spill] sm:$0xff] %v2841_v25  ;;  %v2843_v1 = vpop.eup %2069  ;;  %v916_v61 = vadd.f32 %v2836_v32, %v915_v34  ;;  %v919_v36 = vadd.f32 %v2841_v25, %v2838_v39 }
 0x1cb   : > { %3693 = vst [vmem:[#allocation34_spill] sm:$0xff] %v2843_v1  ;;  %v2848_v20 = vpop.eup %2071 }
 0x1cc   : > { %3694 = vst [vmem:[#allocation35_spill] sm:$0xff] %v2848_v20  ;;  %v2850_v24 = vpop.eup %2073  ;;  %917 = vadd.xlane.f32.xlu1 %v916_v61  ;;  %v920_v59 = vadd.f32 %v2843_v1, %v919_v36  ;;  %v3605_v61 = vlaneseq }
 0x1cd   : > { %3695 = vst [vmem:[#allocation36_spill] sm:$0xff] %v2850_v24  ;;  %v2853_v60 = vpop.eup %2075 }
 0x1ce   : > { %3696 = vst [vmem:[#allocation37_spill] sm:$0xff] %v2853_v60  ;;  %v921_v38 = vadd.f32 %v2848_v20, %v920_v59  ;;  %v924_v63 = vadd.f32 %v2853_v60, %v2850_v24  ;;  %v2858_v14 = vpop.eup %2077  ;;  %v1014_v36 = vshrl.u32 %v3605_v61, 7 }
 0x1cf   : > { %3697 = vst [vmem:[#allocation38_spill] sm:$0xff] %v2858_v14  ;;  %v2861_v25 = vpop.eup %2079 }
 0x1d0   : > { %922 = vadd.xlane.f32.xlu0 %v921_v38  ;;  %v925_v34 = vadd.f32 %v2858_v14, %v924_v63  ;;  %3698 = vst [vmem:[#allocation39_spill] sm:$0xff] %v2861_v25  ;;  %v1015_v59 = vsub.s32 0, %v1014_v36  ;;  %v1019_v20 = vsub.s32 1, %v1014_v36  ;;  %v1011_v38 = vld [vmem:[%s3578_s2] ss:$4 sm:$0xf] }
 0x1d1   : > { %v1023_v60 = vsub.s32 2, %v1014_v36  ;;  %v1027_v63 = vsub.s32 3, %v1014_v36  ;;  %v1925_v36 = vld [vmem:[%s3578_s2 + $0x3] ss:$4 sm:$0xf] }
 0x1d2   : > { %v926_v39 = vadd.f32 %v2861_v25, %v925_v34  ;;  %v1923_v34 = vld [vmem:[%s3578_s2 + $0x1] ss:$4 sm:$0xf]  ;;  %v2876_v61 = vrot.slane %v1011_v38, %v1019_v20  ;;  %v2904_v18 = vrot.slane %v1925_v36, %v1015_v59  ;;  %v2906_v40 = vrot.slane %v1925_v36, %v1019_v20 }
 0x1d3   : > { %v2880_v25 = vrot.slane %v1011_v38, %v1027_v63  ;;  %v2882_v14 = vrot.slane %v1923_v34, %v1015_v59  ;;  %v2884_v24 = vrot.slane %v1923_v34, %v1019_v20  ;;  %v2889_v11 = vrot.slane %v1923_v34, %v1023_v60 }
 0x1d4   : > { %927 = vadd.xlane.f32.xlu1 %v926_v39  ;;  %v2874_v39 = vrot.slane %v1011_v38, %v1015_v59  ;;  %v2891_v26 = vrot.slane %v1923_v34, %v1027_v63  ;;  %v2908_v34 = vrot.slane %v1925_v36, %v1023_v60 }
 0x226   : > { %v853_v32 = vpop.xlane.xlu0 %852 }
 0x227   : > { %2081 = vrcp.f32 %v853_v32  ;;  %v1924_v32 = vld [vmem:[%s3578_s2 + $0x2] ss:$4 sm:$0xf] }
 0x228   : > { %v2893_v8 = vrot.slane %v1924_v32, %v1015_v59  ;;  %v2895_v5 = vrot.slane %v1924_v32, %v1019_v20  ;;  %v2900_v10 = vrot.slane %v1924_v32, %v1023_v60  ;;  %v2902_v48 = vrot.slane %v1924_v32, %v1027_v63 }
 0x229   : > { %v2916_v59 = vrot.slane %v1925_v36, %v1027_v63 }
 0x22a   : > { %v858_v1 = vpop.xlane.xlu1 %857 }
 0x22b   : > { %2083 = vrcp.f32 %v858_v1  ;;  %v2878_v1 = vrot.slane %v1011_v38, %v1023_v60 }
 0x22e   : > { %v863_v44 = vpop.xlane.xlu0 %862 }
 0x22f   : > { %2085 = vrcp.f32 %v863_v44 }
 0x231   : > { %v2082_v27 = vpop.eup %2081 }
 0x232   : > { %v930_v38 = vmul.f32 %v2082_v27, %v2624_v56  ;;  %v931_v58 = vmul.f32 %v2082_v27, %v2626_v46  ;;  %v932_v7 = vmul.f32 %v2082_v27, %v2628_v41  ;;  %v933_v33 = vmul.f32 %v2082_v27, %v2633_v2  ;;  %v868_v20 = vpop.xlane.xlu1 %867 }
 0x233   : > { %2087 = vrcp.f32 %v868_v20 }
 0x234   : > { %v1033_v57 = vmul.f32 %v2874_v39, %v930_v38  ;;  %v1034_v56 = vmul.f32 %v2876_v61, %v931_v58  ;;  %v1035_v41 = vmul.f32 %v2878_v1, %v932_v7  ;;  %v1233_v13 = vmul.f32 %v2882_v14, %v930_v38 }
 0x235   : > { %v2084_v46 = vpop.eup %2083  ;;  %v1234_v32 = vmul.f32 %v2884_v24, %v931_v58  ;;  %v1235_v27 = vmul.f32 %v2889_v11, %v932_v7  ;;  %v1433_v19 = vmul.f32 %v2893_v8, %v930_v38  ;;  %v1036_v63 = vmul.f32 %v2880_v25, %v933_v33 }
 0x236   : > { %v1097_v21 = vadd.f32 %v1034_v56, %v1033_v57  ;;  %v935_v60 = vmul.f32 %v2084_v46, %v2638_v15  ;;  %v2920_v44 = vmul.f32 %v2084_v46, %v2640_v17  ;;  %v2923_v2 = vmul.f32 %v2084_v46, %v2643_v47  ;;  %v873_v43 = vpop.xlane.xlu0 %872 }
 0x237   : > { %v1297_v0 = vadd.f32 %v1234_v32, %v1233_v13  ;;  %v2927_v6 = vmul.f32 %v2084_v46, %v2648_v51  ;;  %v1236_v17 = vmul.f32 %v2891_v26, %v933_v33  ;;  %v1434_v56 = vmul.f32 %v2895_v5, %v931_v58 }
 0x238   : > { %v1098_v36 = vadd.f32 %v1097_v21, %v1035_v41  ;;  %v1037_v57 = vmul.f32 %v2874_v39, %v935_v60  ;;  %v1038_v15 = vmul.f32 %v2876_v61, %v2920_v44  ;;  %v1039_v51 = vmul.f32 %v2878_v1, %v2923_v2 }
 0x239   : > { %v1298_v47 = vadd.f32 %v1297_v0, %v1235_v27  ;;  %v1237_v32 = vmul.f32 %v2882_v14, %v935_v60  ;;  %v1040_v21 = vmul.f32 %v2880_v25, %v2927_v6  ;;  %v1435_v41 = vmul.f32 %v2900_v10, %v932_v7  ;;  %v2086_v52 = vpop.eup %2085 }
 0x23a   : > { %v1099_v13 = vadd.f32 %v1098_v36, %v1036_v63  ;;  %v1102_v46 = vadd.f32 %v1038_v15, %v1037_v57  ;;  %v1497_v3 = vadd.f32 %v1434_v56, %v1433_v19  ;;  %v1238_v20 = vmul.f32 %v2884_v24, %v2920_v44 }
 0x23b   : > { %v1299_v0 = vadd.f32 %v1298_v47, %v1236_v17  ;;  %v1436_v63 = vmul.f32 %v2902_v48, %v933_v33  ;;  %v1633_v36 = vmul.f32 %v2904_v18, %v930_v38  ;;  %v1239_v15 = vmul.f32 %v2889_v11, %v2923_v2 }
 0x23c   : > { %1100 = vadd.xlane.f32.xlu0 %v1099_v13  ;;  %v1103_v27 = vadd.f32 %v1102_v46, %v1039_v51  ;;  %v1498_v57 = vadd.f32 %v1497_v3, %v1435_v41  ;;  %v1302_v53 = vadd.f32 %v1238_v20, %v1237_v32  ;;  %v1634_v12 = vmul.f32 %v2906_v40, %v931_v58  ;;  %v878_v46 = vpop.xlane.xlu1 %877 }
 0x23d   : > { %v1240_v56 = vmul.f32 %v2891_v26, %v2927_v6  ;;  %v1437_v17 = vmul.f32 %v2893_v8, %v935_v60  ;;  %v1438_v47 = vmul.f32 %v2895_v5, %v2920_v44  ;;  %v1635_v38 = vmul.f32 %v2908_v34, %v932_v7 }
 0x23e   : > { %v1104_v19 = vadd.f32 %v1103_v27, %v1040_v21  ;;  %v1303_v13 = vadd.f32 %v1302_v53, %v1239_v15  ;;  %v1636_v3 = vmul.f32 %v2916_v59, %v933_v33  ;;  %v1697_v51 = vadd.f32 %v1634_v12, %v1633_v36  ;;  %v883_v41 = vpop.xlane.xlu0 %882 }
 0x23f   : > { %2089 = vrcp.f32 %v873_v43  ;;  %v1499_v58 = vadd.f32 %v1498_v57, %v1436_v63  ;;  %v1439_v32 = vmul.f32 %v2900_v10, %v2923_v2  ;;  %v1502_v21 = vadd.f32 %v1438_v47, %v1437_v17  ;;  %v2088_v63 = vpop.eup %2087 }
 0x240   : > { %1300 = vadd.xlane.f32.xlu0 %v1299_v0  ;;  %1105 = vadd.xlane.f32.xlu1 %v1104_v19  ;;  %v1698_v20 = vadd.f32 %v1697_v51, %v1635_v38  ;;  %v1440_v27 = vmul.f32 %v2902_v48, %v2927_v6  ;;  %v2961_v53 = vmul.f32 %v2086_v52, %v2654_v28  ;;  %2091 = vrcp.f32 %v878_v46 }
 0x241   : > { %v2964_v33 = vmul.f32 %v2086_v52, %v2656_v55  ;;  %v1304_v12 = vadd.f32 %v1303_v13, %v1240_v56  ;;  %v1503_v43 = vadd.f32 %v1502_v21, %v1439_v32  ;;  %v2967_v7 = vmul.f32 %v2086_v52, %v2659_v16 }
 0x242   : > { %v2970_v0 = vmul.f32 %v2086_v52, %v2664_v22  ;;  %v1041_v36 = vmul.f32 %v2874_v39, %v2961_v53  ;;  %v1637_v57 = vmul.f32 %v2904_v18, %v935_v60  ;;  %2093 = vrcp.f32 %v883_v41  ;;  %v888_v22 = vpop.xlane.xlu1 %887 }
 0x243   : > { %v1042_v28 = vmul.f32 %v2876_v61, %v2964_v33  ;;  %v1699_v55 = vadd.f32 %v1698_v20, %v1636_v3  ;;  %v1504_v15 = vadd.f32 %v1503_v43, %v1440_v27  ;;  %v1043_v16 = vmul.f32 %v2878_v1, %v2967_v7 }
 0x244   : > { %1500 = vadd.xlane.f32.xlu0 %v1499_v58  ;;  %1305 = vadd.xlane.f32.xlu1 %v1304_v12  ;;  %v1044_v52 = vmul.f32 %v2880_v25, %v2970_v0  ;;  %v1638_v56 = vmul.f32 %v2906_v40, %v2920_v44  ;;  %v1639_v17 = vmul.f32 %v2908_v34, %v2923_v2  ;;  %2095 = vrcp.f32 %v888_v22 }
 0x245   : > { %v1107_v19 = vadd.f32 %v1042_v28, %v1041_v36  ;;  %v1640_v47 = vmul.f32 %v2916_v59, %v2927_v6  ;;  %v1241_v13 = vmul.f32 %v2882_v14, %v2961_v53  ;;  %v1242_v38 = vmul.f32 %v2884_v24, %v2964_v33 }
 0x246   : > { %v893_v60 = vpop.xlane.xlu0 %892  ;;  %v1243_v3 = vmul.f32 %v2889_v11, %v2967_v7  ;;  %v1702_v46 = vadd.f32 %v1638_v56, %v1637_v57  ;;  %v1244_v44 = vmul.f32 %v2891_v26, %v2970_v0  ;;  %v2996_v2 = vmul.f32 %v2088_v63, %v2670_v42 }
 0x247   : > { %v1108_v51 = vadd.f32 %v1107_v19, %v1043_v16  ;;  %v1307_v6 = vadd.f32 %v1242_v38, %v1241_v13  ;;  %v2999_v58 = vmul.f32 %v2088_v63, %v2672_v31  ;;  %v3002_v32 = vmul.f32 %v2088_v63, %v2675_v23 }
 0x248   : > { %1700 = vadd.xlane.f32.xlu0 %v1699_v55  ;;  %1505 = vadd.xlane.f32.xlu1 %v1504_v15  ;;  %2097 = vrcp.f32 %v893_v60  ;;  %v1703_v21 = vadd.f32 %v1702_v46, %v1639_v17  ;;  %v3005_v41 = vmul.f32 %v2088_v63, %v2680_v9  ;;  %v1045_v20 = vmul.f32 %v2874_v39, %v2996_v2 }
 0x249   : > { %v2090_v42 = vpop.eup %2089  ;;  %v1109_v12 = vadd.f32 %v1108_v51, %v1044_v52  ;;  %v1308_v43 = vadd.f32 %v1307_v6, %v1243_v3  ;;  %v1046_v36 = vmul.f32 %v2876_v61, %v2999_v58  ;;  %v1441_v31 = vmul.f32 %v2893_v8, %v2961_v53 }
 0x24a   : > { %v898_v27 = vpop.xlane.xlu1 %897  ;;  %v1704_v23 = vadd.f32 %v1703_v21, %v1640_v47  ;;  %v1047_v28 = vmul.f32 %v2878_v1, %v3002_v32  ;;  %v1442_v9 = vmul.f32 %v2895_v5, %v2964_v33  ;;  %v1048_v57 = vmul.f32 %v2880_v25, %v3005_v41  ;;  %v3021_v16 = vpop.eup %2091 }
 0x24b   : > { %2099 = vrcp.f32 %v898_v27  ;;  %v1309_v63 = vadd.f32 %v1308_v43, %v1244_v44  ;;  %v1112_v55 = vadd.f32 %v1046_v36, %v1045_v20  ;;  %v1443_v15 = vmul.f32 %v2900_v10, %v2967_v7 }
 0x24c   : > { %1110 = vadd.xlane.f32.xlu0 %v1109_v12  ;;  %1705 = vadd.xlane.f32.xlu1 %v1704_v23  ;;  %v1444_v22 = vmul.f32 %v2902_v48, %v2970_v0  ;;  %v1507_v52 = vadd.f32 %v1442_v9, %v1441_v31  ;;  %v1245_v19 = vmul.f32 %v2882_v14, %v2996_v2  ;;  %v3029_v17 = vpop.eup %2093 }
 0x24d   : > { %v1246_v56 = vmul.f32 %v2884_v24, %v2999_v58  ;;  %v1113_v47 = vadd.f32 %v1112_v55, %v1047_v28  ;;  %v1247_v13 = vmul.f32 %v2889_v11, %v3002_v32  ;;  %v1641_v38 = vmul.f32 %v2904_v18, %v2961_v53 }
 0x24e   : > { %v903_v60 = vpop.xlane.xlu0 %902  ;;  %v1642_v3 = vmul.f32 %v2906_v40, %v2964_v33  ;;  %v1508_v51 = vadd.f32 %v1507_v52, %v1443_v15  ;;  %v1248_v46 = vmul.f32 %v2891_v26, %v3005_v41  ;;  %v1643_v21 = vmul.f32 %v2908_v34, %v2967_v7  ;;  %v3047_v36 = vpop.eup %2095 }
 0x24f   : > { %2101 = vrcp.f32 %v903_v60  ;;  %v1312_v44 = vadd.f32 %v1246_v56, %v1245_v19  ;;  %v1114_v6 = vadd.f32 %v1113_v47, %v1048_v57  ;;  %v1445_v27 = vmul.f32 %v2893_v8, %v2996_v2 }
 0x250   : > { %1310 = vadd.xlane.f32.xlu0 %v1309_v63  ;;  %v1707_v20 = vadd.f32 %v1642_v3, %v1641_v38  ;;  %v1509_v12 = vadd.f32 %v1508_v51, %v1444_v22  ;;  %v1644_v33 = vmul.f32 %v2916_v59, %v2970_v0  ;;  %v1446_v43 = vmul.f32 %v2895_v5, %v2999_v58 }
 0x251   : > { %v1313_v53 = vadd.f32 %v1312_v44, %v1247_v13  ;;  %1115 = vadd.xlane.f32.xlu1 %v1114_v6  ;;  %v1447_v7 = vmul.f32 %v2900_v10, %v3002_v32  ;;  %v3052_v28 = vmul.f32 %v2090_v42, %v2686_v50  ;;  %v3055_v9 = vmul.f32 %v2090_v42, %v2688_v54 }
 0x252   : > { %v908_v31 = vpop.xlane.xlu1 %907  ;;  %v1708_v23 = vadd.f32 %v1707_v20, %v1643_v21  ;;  %v3057_v63 = vpop.eup %2097  ;;  %v1448_v0 = vmul.f32 %v2902_v48, %v3005_v41  ;;  %v1512_v57 = vadd.f32 %v1446_v43, %v1445_v27  ;;  %v3062_v55 = vmul.f32 %v2090_v42, %v2691_v30 }
 0x253   : > { %2103 = vrcp.f32 %v908_v31  ;;  %v1314_v15 = vadd.f32 %v1313_v53, %v1248_v46  ;;  %v3065_v22 = vmul.f32 %v2090_v42, %v2696_v35  ;;  %v1049_v50 = vmul.f32 %v2874_v39, %v3052_v28 }
 0x254   : > { %1510 = vadd.xlane.f32.xlu0 %v1509_v12  ;;  %v1050_v54 = vmul.f32 %v2876_v61, %v3055_v9  ;;  %v1709_v56 = vadd.f32 %v1708_v23, %v1644_v33  ;;  %v1513_v60 = vadd.f32 %v1512_v57, %v1447_v7  ;;  %v1645_v30 = vmul.f32 %v2904_v18, %v2996_v2 }
 0x255   : > { %v3071_v52 = vpop.eup %2099  ;;  %v913_v19 = vpop.xlane.xlu0 %912  ;;  %v1646_v47 = vmul.f32 %v2906_v40, %v2999_v58  ;;  %1315 = vadd.xlane.f32.xlu1 %v1314_v15  ;;  %v1051_v35 = vmul.f32 %v2878_v1, %v3062_v55  ;;  %v1052_v42 = vmul.f32 %v2880_v25, %v3065_v22  ;;  %v1647_v3 = vmul.f32 %v2908_v34, %v3002_v32 }
 0x256   : > { %2105 = vrcp.f32 %v913_v19  ;;  %v1117_v13 = vadd.f32 %v1050_v54, %v1049_v50  ;;  %v1514_v38 = vadd.f32 %v1513_v60, %v1448_v0  ;;  %v1249_v2 = vmul.f32 %v2882_v14, %v3052_v28 }
 0x257   : > { %v1712_v51 = vadd.f32 %v1646_v47, %v1645_v30  ;;  %v1648_v58 = vmul.f32 %v2916_v59, %v3005_v41  ;;  %v1250_v44 = vmul.f32 %v2884_v24, %v3055_v9  ;;  %v1251_v6 = vmul.f32 %v2889_v11, %v3062_v55 }
 0x258   : > { %1710 = vadd.xlane.f32.xlu0 %v1709_v56  ;;  %v1118_v46 = vadd.f32 %v1117_v13, %v1051_v35  ;;  %v955_v32 = vmul.f32 %v3021_v16, %v2702_v62  ;;  %v3097_v12 = vmul.f32 %v3021_v16, %v2704_v45  ;;  %v3101_v41 = vmul.f32 %v3021_v16, %v2707_v37 }
 0x259   : > { %v3091_v21 = vpop.eup %2101  ;;  %v918_v20 = vpop.xlane.xlu1 %917  ;;  %v1713_v27 = vadd.f32 %v1712_v51, %v1647_v3  ;;  %1515 = vadd.xlane.f32.xlu1 %v1514_v38  ;;  %v1252_v33 = vmul.f32 %v2891_v26, %v3065_v22  ;;  %v1317_v43 = vadd.f32 %v1250_v44, %v1249_v2  ;;  %v3107_v31 = vmul.f32 %v3021_v16, %v2712_v4 }
 0x25a   : > { %v1119_v53 = vadd.f32 %v1118_v46, %v1052_v42  ;;  %2107 = vrcp.f32 %v918_v20  ;;  %v1053_v23 = vmul.f32 %v2874_v39, %v955_v32  ;;  %v1054_v45 = vmul.f32 %v2876_v61, %v3097_v12 }
 0x25b   : > { %v1714_v62 = vadd.f32 %v1713_v27, %v1648_v58  ;;  %v1318_v37 = vadd.f32 %v1317_v43, %v1251_v6  ;;  %v1055_v7 = vmul.f32 %v2878_v1, %v3101_v41  ;;  %v1449_v0 = vmul.f32 %v2893_v8, %v3052_v28 }
 0x25c   : > { %1120 = vadd.xlane.f32.xlu0 %v1119_v53  ;;  %v1450_v57 = vmul.f32 %v2895_v5, %v3055_v9  ;;  %v1056_v15 = vmul.f32 %v2880_v25, %v3107_v31  ;;  %v1122_v50 = vadd.f32 %v1054_v45, %v1053_v23  ;;  %v1451_v54 = vmul.f32 %v2900_v10, %v3062_v55 }
 0x25d   : > { %v3118_v4 = vpop.eup %2103  ;;  %v923_v16 = vpop.xlane.xlu0 %922  ;;  %v1253_v19 = vmul.f32 %v2882_v14, %v955_v32  ;;  %1715 = vadd.xlane.f32.xlu1 %v1714_v62  ;;  %v1319_v56 = vadd.f32 %v1318_v37, %v1252_v33  ;;  %v1452_v60 = vmul.f32 %v2902_v48, %v3065_v22  ;;  %v1254_v47 = vmul.f32 %v2884_v24, %v3097_v12 }
 0x25e   : > { %v1517_v30 = vadd.f32 %v1450_v57, %v1449_v0  ;;  %2109 = vrcp.f32 %v923_v16  ;;  %v1123_v35 = vadd.f32 %v1122_v50, %v1055_v7  ;;  %v1255_v42 = vmul.f32 %v2889_v11, %v3101_v41 }
 0x25f   : > { %v1649_v13 = vmul.f32 %v2904_v18, %v3052_v28  ;;  %v1256_v51 = vmul.f32 %v2891_v26, %v3107_v31  ;;  %v1322_v2 = vadd.f32 %v1254_v47, %v1253_v19  ;;  %v1650_v46 = vmul.f32 %v2906_v40, %v3055_v9 }
 0x260   : > { %v3133_v38 = vpop.eup %2105  ;;  %1320 = vadd.xlane.f32.xlu0 %v1319_v56  ;;  %v1518_v3 = vadd.f32 %v1517_v30, %v1451_v54  ;;  %v1124_v58 = vadd.f32 %v1123_v35, %v1056_v15  ;;  %v1651_v44 = vmul.f32 %v2908_v34, %v3062_v55  ;;  %v1453_v6 = vmul.f32 %v2893_v8, %v955_v32  ;;  %v3700_v15 = vld [vmem:[#allocation17_spill] sm:$0xff] }
 0x261   : > { %v1454_v28 = vmul.f32 %v2895_v5, %v3097_v12  ;;  %v1323_v27 = vadd.f32 %v1322_v2, %v1255_v42  ;;  %v1652_v53 = vmul.f32 %v2916_v59, %v3065_v22  ;;  %v1717_v33 = vadd.f32 %v1650_v46, %v1649_v13  ;;  %v928_v43 = vpop.xlane.xlu1 %927  ;;  %v3699_v22 = vld [vmem:[#allocation16_spill] sm:$0xff]  ;;  %v3701_v2 = vld [vmem:[#allocation18_spill] sm:$0xff] }
 0x262   : > { %v1519_v20 = vadd.f32 %v1518_v3, %v1452_v60  ;;  %1125 = vadd.xlane.f32.xlu1 %v1124_v58  ;;  %v1455_v9 = vmul.f32 %v2900_v10, %v3101_v41  ;;  %v1456_v62 = vmul.f32 %v2902_v48, %v3107_v31  ;;  %v960_v23 = vmul.f32 %v3029_v17, %v2718_v49  ;;  %v3702_v58 = vld [vmem:[#allocation19_spill] sm:$0xff] }
 0x263   : > { %v1522_v55 = vadd.f32 %v1454_v28, %v1453_v6  ;;  %v1324_v45 = vadd.f32 %v1323_v27, %v1256_v51  ;;  %v1718_v37 = vadd.f32 %v1717_v33, %v1651_v44  ;;  %v961_v7 = vmul.f32 %v3029_v17, %v2720_v29 }
 0x264   : > { %1520 = vadd.xlane.f32.xlu0 %v1519_v20  ;;  %v962_v0 = vmul.f32 %v3029_v17, %v3699_v22  ;;  %v3156_v57 = vpop.eup %2107  ;;  %v963_v50 = vmul.f32 %v3029_v17, %v3700_v15  ;;  %v1057_v54 = vmul.f32 %v2874_v39, %v960_v23  ;;  %v1653_v19 = vmul.f32 %v2904_v18, %v955_v32  ;;  %v3703_v20 = vld [vmem:[#allocation20_spill] sm:$0xff] }
 0x265   : > { %v1523_v16 = vadd.f32 %v1522_v55, %v1455_v9  ;;  %2111 = vrcp.f32 %v928_v43  ;;  %v1719_v49 = vadd.f32 %v1718_v37, %v1652_v53  ;;  %v1058_v56 = vmul.f32 %v2876_v61, %v961_v7  ;;  %v3704_v53 = vld [vmem:[#allocation21_spill] sm:$0xff] }
 0x266   : > { %v1654_v29 = vmul.f32 %v2906_v40, %v3097_v12  ;;  %1325 = vadd.xlane.f32.xlu1 %v1324_v45  ;;  %v1059_v30 = vmul.f32 %v2878_v1, %v962_v0  ;;  %v1060_v47 = vmul.f32 %v2880_v25, %v963_v50  ;;  %v1655_v17 = vmul.f32 %v2908_v34, %v3101_v41 }
 0x267   : > { %v1524_v60 = vadd.f32 %v1523_v16, %v1456_v62  ;;  %v1127_v35 = vadd.f32 %v1058_v56, %v1057_v54  ;;  %v1257_v32 = vmul.f32 %v2882_v14, %v960_v23  ;;  %v1258_v13 = vmul.f32 %v2884_v24, %v961_v7 }
 0x268   : > { %1720 = vadd.xlane.f32.xlu0 %v1719_v49  ;;  %v1722_v42 = vadd.f32 %v1654_v29, %v1653_v19  ;;  %v3171_v3 = vpop.eup %2109  ;;  %v1656_v12 = vmul.f32 %v2916_v59, %v3107_v31  ;;  %v1259_v51 = vmul.f32 %v2889_v11, %v962_v0  ;;  %v965_v46 = vmul.f32 %v3047_v36, %v3701_v2 }
 0x269   : > { %v966_v41 = vmul.f32 %v3047_v36, %v3702_v58  ;;  %v1128_v44 = vadd.f32 %v1127_v35, %v1059_v30  ;;  %v1327_v28 = vadd.f32 %v1258_v13, %v1257_v32  ;;  %v967_v27 = vmul.f32 %v3047_v36, %v3703_v20 }
 0x26a   : > { %v1723_v6 = vadd.f32 %v1722_v42, %v1655_v17  ;;  %1525 = vadd.xlane.f32.xlu1 %v1524_v60  ;;  %v968_v33 = vmul.f32 %v3047_v36, %v3704_v53  ;;  %v1061_v31 = vmul.f32 %v2874_v39, %v965_v46  ;;  %v1457_v9 = vmul.f32 %v2893_v8, %v960_v23 }
 0x26b   : > { %v1062_v43 = vmul.f32 %v2876_v61, %v966_v41  ;;  %v1129_v62 = vadd.f32 %v1128_v44, %v1060_v47  ;;  %v1260_v45 = vmul.f32 %v2891_v26, %v963_v50  ;;  %v1328_v37 = vadd.f32 %v1327_v28, %v1259_v51 }
 0x26c   : > { %v1724_v55 = vadd.f32 %v1723_v6, %v1656_v12  ;;  %v1063_v22 = vmul.f32 %v2878_v1, %v967_v27  ;;  %v1064_v16 = vmul.f32 %v2880_v25, %v968_v33  ;;  %v1458_v54 = vmul.f32 %v2895_v5, %v961_v7 }
 0x26d   : > { %v1132_v15 = vadd.f32 %v1062_v43, %v1061_v31  ;;  %1130 = vadd.xlane.f32.xlu0 %v1129_v62  ;;  %v1329_v36 = vadd.f32 %v1328_v37, %v1260_v45  ;;  %v1459_v19 = vmul.f32 %v2900_v10, %v962_v0  ;;  %v1261_v49 = vmul.f32 %v2882_v14, %v965_v46  ;;  %v3706_v43 = vld [vmem:[#allocation23_spill] sm:$0xff]  ;;  %v3707_v45 = vld [vmem:[#allocation24_spill] sm:$0xff] }
 0x26e   : > { %v1262_v56 = vmul.f32 %v2884_v24, %v966_v41  ;;  %1725 = vadd.xlane.f32.xlu1 %v1724_v55  ;;  %v1460_v60 = vmul.f32 %v2902_v48, %v963_v50  ;;  %v1527_v30 = vadd.f32 %v1458_v54, %v1457_v9  ;;  %v1263_v47 = vmul.f32 %v2889_v11, %v967_v27 }
 0x26f   : > { %v1133_v29 = vadd.f32 %v1132_v15, %v1063_v22  ;;  %v3196_v17 = vpop.eup %2111  ;;  %v1264_v35 = vmul.f32 %v2891_v26, %v968_v33  ;;  %v1657_v32 = vmul.f32 %v2904_v18, %v960_v23  ;;  %v1658_v13 = vmul.f32 %v2906_v40, %v961_v7  ;;  %v3705_v23 = vld [vmem:[#allocation22_spill] sm:$0xff] }
 0x270   : > { %v1332_v42 = vadd.f32 %v1262_v56, %v1261_v49  ;;  %v1528_v51 = vadd.f32 %v1527_v30, %v1459_v19  ;;  %v1659_v2 = vmul.f32 %v2908_v34, %v962_v0  ;;  %v1461_v58 = vmul.f32 %v2893_v8, %v965_v46 }
 0x271   : > { %v1134_v12 = vadd.f32 %v1133_v29, %v1064_v16  ;;  %1330 = vadd.xlane.f32.xlu0 %v1329_v36  ;;  %v1660_v6 = vmul.f32 %v2916_v59, %v963_v50  ;;  %v1727_v28 = vadd.f32 %v1658_v13, %v1657_v32  ;;  %v1462_v20 = vmul.f32 %v2895_v5, %v966_v41  ;;  %v3708_v50 = vld [vmem:[#allocation2_spill] sm:$0xff] }
 0x272   : > { %v1333_v44 = vadd.f32 %v1332_v42, %v1263_v47  ;;  %v1529_v53 = vadd.f32 %v1528_v51, %v1460_v60  ;;  %v1463_v31 = vmul.f32 %v2900_v10, %v967_v27  ;;  %v970_v7 = vmul.f32 %v3057_v63, %v3705_v23 }
 0x273   : > { %1135 = vadd.xlane.f32.xlu1 %v1134_v12  ;;  %v971_v9 = vmul.f32 %v3057_v63, %v3706_v43  ;;  %v1728_v62 = vadd.f32 %v1727_v28, %v1659_v2  ;;  %v1532_v55 = vadd.f32 %v1462_v20, %v1461_v58  ;;  %v972_v37 = vmul.f32 %v3057_v63, %v3707_v45  ;;  %v3712_v20 = vld [vmem:[#allocation6_spill] sm:$0xff] }
 0x274   : > { %v1334_v0 = vadd.f32 %v1333_v44, %v1264_v35  ;;  %v973_v22 = vmul.f32 %v3057_v63, %v3708_v50  ;;  %v1065_v16 = vmul.f32 %v2874_v39, %v970_v7  ;;  %v1661_v54 = vmul.f32 %v2904_v18, %v965_v46  ;;  %v3710_v44 = vld [vmem:[#allocation4_spill] sm:$0xff] }
 0x275   : > { %v1066_v15 = vmul.f32 %v2876_v61, %v971_v9  ;;  %1530 = vadd.xlane.f32.xlu0 %v1529_v53  ;;  %v1729_v36 = vadd.f32 %v1728_v62, %v1660_v6  ;;  %v1464_v19 = vmul.f32 %v2902_v48, %v968_v33  ;;  %v1533_v49 = vadd.f32 %v1532_v55, %v1463_v31  ;;  %v3711_v6 = vld [vmem:[#allocation5_spill] sm:$0xff] }
 0x276   : > { %v1662_v56 = vmul.f32 %v2906_v40, %v966_v41  ;;  %v1067_v29 = vmul.f32 %v2878_v1, %v972_v37  ;;  %v1068_v60 = vmul.f32 %v2880_v25, %v973_v22  ;;  %v1663_v63 = vmul.f32 %v2908_v34, %v967_v27  ;;  %v3709_v41 = vld [vmem:[#allocation3_spill] sm:$0xff] }
 0x277   : > { %1335 = vadd.xlane.f32.xlu1 %v1334_v0  ;;  %v1137_v30 = vadd.f32 %v1066_v15, %v1065_v16  ;;  %v1664_v47 = vmul.f32 %v2916_v59, %v968_v33  ;;  %v1265_v46 = vmul.f32 %v2882_v14, %v970_v7  ;;  %v1266_v42 = vmul.f32 %v2884_v24, %v971_v9 }
 0x278   : > { %v1732_v35 = vadd.f32 %v1662_v56, %v1661_v54  ;;  %v1534_v32 = vadd.f32 %v1533_v49, %v1464_v19  ;;  %v1267_v12 = vmul.f32 %v2889_v11, %v972_v37  ;;  %v975_v51 = vmul.f32 %v3071_v52, %v3709_v41 }
 0x279   : > { %v1138_v13 = vadd.f32 %v1137_v30, %v1067_v29  ;;  %1730 = vadd.xlane.f32.xlu0 %v1729_v36  ;;  %v1337_v58 = vadd.f32 %v1266_v42, %v1265_v46  ;;  %v976_v27 = vmul.f32 %v3071_v52, %v3710_v44  ;;  %v977_v33 = vmul.f32 %v3071_v52, %v3711_v6 }
 0x27a   : > { %v1733_v2 = vadd.f32 %v1732_v35, %v1663_v63  ;;  %v1268_v28 = vmul.f32 %v2891_v26, %v973_v22  ;;  %v978_v53 = vmul.f32 %v3071_v52, %v3712_v20  ;;  %v1069_v31 = vmul.f32 %v2874_v39, %v975_v51 }
 0x27b   : > { %1535 = vadd.xlane.f32.xlu1 %v1534_v32  ;;  %v1465_v23 = vmul.f32 %v2893_v8, %v970_v7  ;;  %v1139_v43 = vadd.f32 %v1138_v13, %v1068_v60  ;;  %v1338_v62 = vadd.f32 %v1337_v58, %v1267_v12  ;;  %v1070_v55 = vmul.f32 %v2876_v61, %v976_v27 }
 0x27c   : > { %v1734_v0 = vadd.f32 %v1733_v2, %v1664_v47  ;;  %v1071_v45 = vmul.f32 %v2878_v1, %v977_v33  ;;  %v1072_v50 = vmul.f32 %v2880_v25, %v978_v53  ;;  %v1466_v16 = vmul.f32 %v2895_v5, %v971_v9 }
 0x27d   : > { %v1467_v15 = vmul.f32 %v2900_v10, %v972_v37  ;;  %1140 = vadd.xlane.f32.xlu0 %v1139_v43  ;;  %v1142_v54 = vadd.f32 %v1070_v55, %v1069_v31  ;;  %v1468_v52 = vmul.f32 %v2902_v48, %v973_v22  ;;  %v1269_v36 = vmul.f32 %v2882_v14, %v975_v51  ;;  %v3714_v31 = vld [vmem:[#allocation8_spill] sm:$0xff]  ;;  %v3715_v43 = vld [vmem:[#allocation9_spill] sm:$0xff] }
 0x27e   : > { %v1270_v19 = vmul.f32 %v2884_v24, %v976_v27  ;;  %v1339_v49 = vadd.f32 %v1338_v62, %v1268_v28  ;;  %v1537_v56 = vadd.f32 %v1466_v16, %v1465_v23  ;;  %v1271_v29 = vmul.f32 %v2889_v11, %v977_v33  ;;  %v3713_v28 = vld [vmem:[#allocation7_spill] sm:$0xff] }
 0x27f   : > { %1735 = vadd.xlane.f32.xlu1 %v1734_v0  ;;  %v1665_v60 = vmul.f32 %v2904_v18, %v970_v7  ;;  %v1143_v30 = vadd.f32 %v1142_v54, %v1071_v45  ;;  %v1272_v63 = vmul.f32 %v2891_v26, %v978_v53  ;;  %v1666_v35 = vmul.f32 %v2906_v40, %v971_v9 }
 0x280   : > { %v1342_v47 = vadd.f32 %v1270_v19, %v1269_v36  ;;  %v1538_v46 = vadd.f32 %v1537_v56, %v1467_v15  ;;  %v1667_v42 = vmul.f32 %v2908_v34, %v972_v37  ;;  %v1469_v32 = vmul.f32 %v2893_v8, %v975_v51 }
 0x281   : > { %v1470_v13 = vmul.f32 %v2895_v5, %v976_v27  ;;  %1340 = vadd.xlane.f32.xlu0 %v1339_v49  ;;  %v1144_v12 = vadd.f32 %v1143_v30, %v1072_v50  ;;  %v1668_v2 = vmul.f32 %v2916_v59, %v973_v22  ;;  %v1737_v58 = vadd.f32 %v1666_v35, %v1665_v60  ;;  %v3716_v22 = vld [vmem:[#allocation10_spill] sm:$0xff]  ;;  %v3718_v35 = vld [vmem:[#allocation12_spill] sm:$0xff] }
 0x282   : > { %v1343_v41 = vadd.f32 %v1342_v47, %v1271_v29  ;;  %v1539_v7 = vadd.f32 %v1538_v46, %v1468_v52  ;;  %v1471_v44 = vmul.f32 %v2900_v10, %v977_v33  ;;  %v980_v9 = vmul.f32 %v3091_v21, %v3713_v28  ;;  %v3717_v47 = vld [vmem:[#allocation11_spill] sm:$0xff] }
 0x283   : > { %v1542_v6 = vadd.f32 %v1470_v13, %v1469_v32  ;;  %1145 = vadd.xlane.f32.xlu1 %v1144_v12  ;;  %v1738_v20 = vadd.f32 %v1737_v58, %v1667_v42  ;;  %v1472_v37 = vmul.f32 %v2902_v48, %v978_v53  ;;  %v981_v23 = vmul.f32 %v3091_v21, %v3714_v31  ;;  %v3719_v13 = vld [vmem:[#allocation13_spill] sm:$0xff] }
 0x284   : > { %v982_v0 = vmul.f32 %v3091_v21, %v3715_v43  ;;  %v983_v55 = vmul.f32 %v3091_v21, %v3716_v22  ;;  %v1073_v45 = vmul.f32 %v2874_v39, %v980_v9  ;;  %v1669_v50 = vmul.f32 %v2904_v18, %v975_v51 }
 0x285   : > { %v1543_v62 = vadd.f32 %v1542_v6, %v1471_v44  ;;  %1540 = vadd.xlane.f32.xlu0 %v1539_v7  ;;  %v1344_v16 = vadd.f32 %v1343_v41, %v1272_v63  ;;  %v1739_v15 = vadd.f32 %v1738_v20, %v1668_v2  ;;  %v1074_v54 = vmul.f32 %v2876_v61, %v981_v23  ;;  %v3720_v41 = vld [vmem:[#allocation14_spill] sm:$0xff] }
 0x286   : > { %v1670_v52 = vmul.f32 %v2906_v40, %v976_v27  ;;  %v1075_v19 = vmul.f32 %v2878_v1, %v982_v0  ;;  %v1076_v49 = vmul.f32 %v2880_v25, %v983_v55  ;;  %v1671_v56 = vmul.f32 %v2908_v34, %v977_v33 }
 0x287   : > { %v1544_v36 = vadd.f32 %v1543_v62, %v1472_v37  ;;  %1345 = vadd.xlane.f32.xlu1 %v1344_v16  ;;  %v1147_v21 = vadd.f32 %v1074_v54, %v1073_v45  ;;  %v1273_v60 = vmul.f32 %v2882_v14, %v980_v9  ;;  %v1274_v51 = vmul.f32 %v2884_v24, %v981_v23 }
 0x288   : > { %v1742_v29 = vadd.f32 %v1670_v52, %v1669_v50  ;;  %v1672_v30 = vmul.f32 %v2916_v59, %v978_v53  ;;  %v1275_v63 = vmul.f32 %v2889_v11, %v982_v0  ;;  %v985_v27 = vmul.f32 %v3118_v4, %v3717_v47 }
 0x289   : > { %v986_v46 = vmul.f32 %v3118_v4, %v3718_v35  ;;  %1740 = vadd.xlane.f32.xlu0 %v1739_v15  ;;  %v1148_v42 = vadd.f32 %v1147_v21, %v1075_v19  ;;  %v1347_v32 = vadd.f32 %v1274_v51, %v1273_v60  ;;  %v987_v12 = vmul.f32 %v3118_v4, %v3719_v13 }
 0x28a   : > { %v1743_v33 = vadd.f32 %v1742_v29, %v1671_v56  ;;  %v988_v2 = vmul.f32 %v3118_v4, %v3720_v41  ;;  %v1077_v53 = vmul.f32 %v2874_v39, %v985_v27  ;;  %v1473_v7 = vmul.f32 %v2893_v8, %v980_v9 }
 0x28b   : > { %v1078_v58 = vmul.f32 %v2876_v61, %v986_v46  ;;  %1545 = vadd.xlane.f32.xlu1 %v1544_v36  ;;  %v1149_v44 = vadd.f32 %v1148_v42, %v1076_v49  ;;  %v1276_v28 = vmul.f32 %v2891_v26, %v983_v55  ;;  %v1348_v20 = vadd.f32 %v1347_v32, %v1275_v63  ;;  %v3721_v32 = vld [vmem:[#allocation15_spill] sm:$0xff] }
 0x28c   : > { %v1744_v6 = vadd.f32 %v1743_v33, %v1672_v30  ;;  %v1079_v37 = vmul.f32 %v2878_v1, %v987_v12  ;;  %v1080_v31 = vmul.f32 %v2880_v25, %v988_v2  ;;  %v1474_v62 = vmul.f32 %v2895_v5, %v981_v23 }
 0x28d   : > { %v1152_v43 = vadd.f32 %v1078_v58, %v1077_v53  ;;  %1150 = vadd.xlane.f32.xlu0 %v1149_v44  ;;  %v1349_v4 = vadd.f32 %v1348_v20, %v1276_v28  ;;  %v1475_v22 = vmul.f32 %v2900_v10, %v982_v0  ;;  %v1277_v45 = vmul.f32 %v2882_v14, %v985_v27  ;;  %v3723_v58 = vld [vmem:[#allocation26_spill] sm:$0xff] }
 0x28e   : > { %v1278_v50 = vmul.f32 %v2884_v24, %v986_v46  ;;  %v1476_v15 = vmul.f32 %v2902_v48, %v983_v55  ;;  %v1547_v54 = vadd.f32 %v1474_v62, %v1473_v7  ;;  %v1279_v52 = vmul.f32 %v2889_v11, %v987_v12  ;;  %v3724_v7 = vld [vmem:[#allocation27_spill] sm:$0xff] }
 0x28f   : > { %v1153_v16 = vadd.f32 %v1152_v43, %v1079_v37  ;;  %1745 = vadd.xlane.f32.xlu1 %v1744_v6  ;;  %v1280_v36 = vmul.f32 %v2891_v26, %v988_v2  ;;  %v1673_v49 = vmul.f32 %v2904_v18, %v980_v9  ;;  %v1674_v56 = vmul.f32 %v2906_v40, %v981_v23  ;;  %v3722_v23 = vld [vmem:[#allocation25_spill] sm:$0xff] }
 0x290   : > { %v1352_v19 = vadd.f32 %v1278_v50, %v1277_v45  ;;  %v1548_v29 = vadd.f32 %v1547_v54, %v1475_v22  ;;  %v1675_v60 = vmul.f32 %v2908_v34, %v982_v0  ;;  %v1477_v51 = vmul.f32 %v2893_v8, %v985_v27 }
 0x291   : > { %v1154_v21 = vadd.f32 %v1153_v16, %v1080_v31  ;;  %1350 = vadd.xlane.f32.xlu0 %v1349_v4  ;;  %v1676_v63 = vmul.f32 %v2916_v59, %v983_v55  ;;  %v1747_v47 = vadd.f32 %v1674_v56, %v1673_v49  ;;  %v1478_v35 = vmul.f32 %v2895_v5, %v986_v46 }
 0x292   : > { %v1353_v30 = vadd.f32 %v1352_v19, %v1279_v52  ;;  %v1549_v42 = vadd.f32 %v1548_v29, %v1476_v15  ;;  %v1479_v33 = vmul.f32 %v2900_v10, %v987_v12  ;;  %v990_v9 = vmul.f32 %v3133_v38, %v3721_v32  ;;  %v3727_v29 = vld [vmem:[#allocation30_spill] sm:$0xff] }
 0x293   : > { %v991_v13 = vmul.f32 %v3133_v38, %v3722_v23  ;;  %1155 = vadd.xlane.f32.xlu1 %v1154_v21  ;;  %v1748_v0 = vadd.f32 %v1747_v47, %v1675_v60  ;;  %v1480_v41 = vmul.f32 %v2902_v48, %v988_v2  ;;  %v1552_v53 = vadd.f32 %v1478_v35, %v1477_v51  ;;  %v3726_v21 = vld [vmem:[#allocation29_spill] sm:$0xff]  ;;  %v3728_v51 = vld [vmem:[#allocation31_spill] sm:$0xff] }
 0x294   : > { %v992_v55 = vmul.f32 %v3133_v38, %v3723_v58  ;;  %v993_v44 = vmul.f32 %v3133_v38, %v3724_v7  ;;  %v1081_v6 = vmul.f32 %v2874_v39, %v990_v9  ;;  %v1677_v20 = vmul.f32 %v2904_v18, %v985_v27 }
 0x295   : > { %v1082_v28 = vmul.f32 %v2876_v61, %v991_v13  ;;  %1550 = vadd.xlane.f32.xlu0 %v1549_v42  ;;  %v1354_v37 = vadd.f32 %v1353_v30, %v1280_v36  ;;  %v1749_v31 = vadd.f32 %v1748_v0, %v1676_v63  ;;  %v1553_v43 = vadd.f32 %v1552_v53, %v1479_v33 }
 0x296   : > { %v1678_v62 = vmul.f32 %v2906_v40, %v986_v46  ;;  %v1083_v4 = vmul.f32 %v2878_v1, %v992_v55  ;;  %v1084_v22 = vmul.f32 %v2880_v25, %v993_v44  ;;  %v1679_v50 = vmul.f32 %v2908_v34, %v987_v12  ;;  %v3725_v46 = vld [vmem:[#allocation28_spill] sm:$0xff] }
 0x297   : > { %v1157_v45 = vadd.f32 %v1082_v28, %v1081_v6  ;;  %1355 = vadd.xlane.f32.xlu1 %v1354_v37  ;;  %v1680_v38 = vmul.f32 %v2916_v59, %v988_v2  ;;  %v1281_v15 = vmul.f32 %v2882_v14, %v990_v9  ;;  %v1282_v27 = vmul.f32 %v2884_v24, %v991_v13 }
 0x298   : > { %v1752_v16 = vadd.f32 %v1678_v62, %v1677_v20  ;;  %v1554_v54 = vadd.f32 %v1553_v43, %v1480_v41  ;;  %v1283_v36 = vmul.f32 %v2889_v11, %v992_v55  ;;  %v995_v19 = vmul.f32 %v3156_v57, %v3725_v46 }
 0x299   : > { %v1158_v52 = vadd.f32 %v1157_v45, %v1083_v4  ;;  %1750 = vadd.xlane.f32.xlu0 %v1749_v31  ;;  %v1357_v56 = vadd.f32 %v1282_v27, %v1281_v15  ;;  %v996_v12 = vmul.f32 %v3156_v57, %v3726_v21  ;;  %v997_v2 = vmul.f32 %v3156_v57, %v3727_v29  ;;  %v3730_v21 = vld [vmem:[#allocation33_spill] sm:$0xff] }
 0x29a   : > { %v1753_v49 = vadd.f32 %v1752_v16, %v1679_v50  ;;  %v1284_v60 = vmul.f32 %v2891_v26, %v993_v44  ;;  %v3331_v30 = vmul.f32 %v3156_v57, %v3728_v51  ;;  %v1085_v63 = vmul.f32 %v2874_v39, %v995_v19 }
 0x29b   : > { %v1481_v47 = vmul.f32 %v2893_v8, %v990_v9  ;;  %1555 = vadd.xlane.f32.xlu1 %v1554_v54  ;;  %v1159_v35 = vadd.f32 %v1158_v52, %v1084_v22  ;;  %v1358_v33 = vadd.f32 %v1357_v56, %v1283_v36  ;;  %v1086_v32 = vmul.f32 %v2876_v61, %v996_v12 }
 0x29c   : > { %v1754_v42 = vadd.f32 %v1753_v49, %v1680_v38  ;;  %v1087_v23 = vmul.f32 %v2878_v1, %v997_v2  ;;  %v1088_v0 = vmul.f32 %v2880_v25, %v3331_v30  ;;  %v1482_v41 = vmul.f32 %v2895_v5, %v991_v13  ;;  %v3729_v49 = vld [vmem:[#allocation32_spill] sm:$0xff] }
 0x29d   : > { %v1483_v57 = vmul.f32 %v2900_v10, %v992_v55  ;;  %1160 = vadd.xlane.f32.xlu0 %v1159_v35  ;;  %v1162_v53 = vadd.f32 %v1086_v32, %v1085_v63  ;;  %v1484_v58 = vmul.f32 %v2902_v48, %v993_v44  ;;  %v1285_v7 = vmul.f32 %v2882_v14, %v995_v19  ;;  %v3732_v63 = vld [vmem:[#allocation35_spill] sm:$0xff] }
 0x29e   : > { %v1286_v6 = vmul.f32 %v2884_v24, %v996_v12  ;;  %v1359_v28 = vadd.f32 %v1358_v33, %v1284_v60  ;;  %v1557_v20 = vadd.f32 %v1482_v41, %v1481_v47  ;;  %v1287_v37 = vmul.f32 %v2889_v11, %v997_v2  ;;  %v3731_v60 = vld [vmem:[#allocation34_spill] sm:$0xff] }
 0x29f   : > { %v1681_v31 = vmul.f32 %v2904_v18, %v990_v9  ;;  %1755 = vadd.xlane.f32.xlu1 %v1754_v42  ;;  %v1163_v43 = vadd.f32 %v1162_v53, %v1087_v23  ;;  %v1288_v62 = vmul.f32 %v2891_v26, %v3331_v30  ;;  %v1682_v22 = vmul.f32 %v2906_v40, %v991_v13 }
 0x2a0   : > { %v1362_v4 = vadd.f32 %v1286_v6, %v1285_v7  ;;  %v1558_v45 = vadd.f32 %v1557_v20, %v1483_v57  ;;  %v1683_v50 = vmul.f32 %v2908_v34, %v992_v55  ;;  %v1485_v38 = vmul.f32 %v2893_v8, %v995_v19  ;;  %v3733_v20 = vld [vmem:[#allocation36_spill] sm:$0xff] }
 0x2a1   : > { %v1486_v16 = vmul.f32 %v2895_v5, %v996_v12  ;;  %1360 = vadd.xlane.f32.xlu0 %v1359_v28  ;;  %v1164_v15 = vadd.f32 %v1163_v43, %v1088_v0  ;;  %v1684_v9 = vmul.f32 %v2916_v59, %v993_v44  ;;  %v1757_v54 = vadd.f32 %v1682_v22, %v1681_v31 }
 0x2a2   : > { %v1363_v27 = vadd.f32 %v1362_v4, %v1287_v37  ;;  %v1559_v52 = vadd.f32 %v1558_v45, %v1484_v58  ;;  %v1487_v36 = vmul.f32 %v2900_v10, %v997_v2  ;;  %v1000_v13 = vmul.f32 %v3171_v3, %v3729_v49  ;;  %v3734_v37 = vld [vmem:[#allocation37_spill] sm:$0xff]  ;;  %v3735_v4 = vld [vmem:[#allocation38_spill] sm:$0xff]  ;;  %v3736_v45 = vld [vmem:[#allocation39_spill] sm:$0xff] }
 0x2a3   : > { %v1562_v46 = vadd.f32 %v1486_v16, %v1485_v38  ;;  %1165 = vadd.xlane.f32.xlu1 %v1164_v15  ;;  %v1758_v56 = vadd.f32 %v1757_v54, %v1683_v50  ;;  %v1488_v55 = vmul.f32 %v2902_v48, %v3331_v30  ;;  %v1001_v29 = vmul.f32 %v3171_v3, %v3730_v21 }
 0x2a4   : > { %v1002_v51 = vmul.f32 %v3171_v3, %v3731_v60  ;;  %v3364_v47 = vmul.f32 %v3171_v3, %v3732_v63  ;;  %v1089_v35 = vmul.f32 %v2874_v39, %v1000_v13  ;;  %v1685_v42 = vmul.f32 %v2904_v18, %v995_v19 }
 0x2a5   : > { %v1563_v44 = vadd.f32 %v1562_v46, %v1487_v36  ;;  %1560 = vadd.xlane.f32.xlu0 %v1559_v52  ;;  %v1364_v33 = vadd.f32 %v1363_v27, %v1288_v62  ;;  %v1090_v32 = vmul.f32 %v2876_v61, %v1001_v29  ;;  %v1686_v23 = vmul.f32 %v2906_v40, %v996_v12 }
 0x2a6   : > { %v1759_v0 = vadd.f32 %v1758_v56, %v1684_v9  ;;  %v1091_v57 = vmul.f32 %v2878_v1, %v1002_v51  ;;  %v1687_v53 = vmul.f32 %v2908_v34, %v997_v2  ;;  %v1289_v7 = vmul.f32 %v2882_v14, %v1000_v13 }
 0x2a7   : > { %v1564_v41 = vadd.f32 %v1563_v44, %v1488_v55  ;;  %1365 = vadd.xlane.f32.xlu1 %v1364_v33  ;;  %v1167_v58 = vadd.f32 %v1090_v32, %v1089_v35  ;;  %v1762_v3 = vadd.f32 %v1686_v23, %v1685_v42  ;;  %v1290_v6 = vmul.f32 %v2884_v24, %v1001_v29 }
 0x2a8   : > { %v1092_v19 = vmul.f32 %v2880_v25, %v3364_v47  ;;  %v1291_v28 = vmul.f32 %v2889_v11, %v1002_v51  ;;  %v1005_v12 = vmul.f32 %v3196_v17, %v3733_v20  ;;  %v1006_v31 = vmul.f32 %v3196_v17, %v3734_v37 }
 0x2a9   : > { %1760 = vadd.xlane.f32.xlu0 %v1759_v0  ;;  %v1168_v2 = vadd.f32 %v1167_v58, %v1091_v57  ;;  %v1763_v43 = vadd.f32 %v1762_v3, %v1687_v53  ;;  %v1367_v62 = vadd.f32 %v1290_v6, %v1289_v7  ;;  %v1007_v22 = vmul.f32 %v3196_v17, %v3735_v4 }
 0x2aa   : > { %v1008_v50 = vmul.f32 %v3196_v17, %v3736_v45  ;;  %v1093_v38 = vmul.f32 %v2874_v39, %v1005_v12  ;;  %v1094_v16 = vmul.f32 %v2876_v61, %v1006_v31  ;;  %v1489_v15 = vmul.f32 %v2893_v8, %v1000_v13 }
 0x2ab   : > { %1565 = vadd.xlane.f32.xlu1 %v1564_v41  ;;  %v1169_v27 = vadd.f32 %v1168_v2, %v1092_v19  ;;  %v1688_v9 = vmul.f32 %v2916_v59, %v3331_v30  ;;  %v1368_v54 = vadd.f32 %v1367_v62, %v1291_v28  ;;  %v1292_v52 = vmul.f32 %v2891_v26, %v3364_v47 }
 0x2ac   : > { %v1095_v36 = vmul.f32 %v2878_v1, %v1007_v22  ;;  %v1172_v46 = vadd.f32 %v1094_v16, %v1093_v38  ;;  %v1490_v17 = vmul.f32 %v2895_v5, %v1001_v29  ;;  %v1096_v61 = vmul.f32 %v2880_v25, %v1008_v50 }
 0x2ad   : > { %1170 = vadd.xlane.f32.xlu0 %v1169_v27  ;;  %v1764_v39 = vadd.f32 %v1763_v43, %v1688_v9  ;;  %v1293_v49 = vmul.f32 %v2882_v14, %v1005_v12  ;;  %v1294_v56 = vmul.f32 %v2884_v24, %v1006_v31  ;;  %v1369_v55 = vadd.f32 %v1368_v54, %v1292_v52 }
 0x2ae   : > { %v1173_v21 = vadd.f32 %v1172_v46, %v1095_v36  ;;  %v1491_v30 = vmul.f32 %v2900_v10, %v1002_v51  ;;  %v1567_v60 = vadd.f32 %v1490_v17, %v1489_v15  ;;  %v1295_v44 = vmul.f32 %v2889_v11, %v1007_v22 }
 0x2af   : > { %1765 = vadd.xlane.f32.xlu1 %v1764_v39  ;;  %v1372_v1 = vadd.f32 %v1294_v56, %v1293_v49  ;;  %v1689_v63 = vmul.f32 %v2904_v18, %v1000_v13  ;;  %v1690_v35 = vmul.f32 %v2906_v40, %v1001_v29  ;;  %v1492_v25 = vmul.f32 %v2902_v48, %v3364_v47 }
 0x2b0   : > { %v1568_v42 = vadd.f32 %v1567_v60, %v1491_v30  ;;  %v1691_v14 = vmul.f32 %v2908_v34, %v1002_v51  ;;  %v1493_v24 = vmul.f32 %v2893_v8, %v1005_v12  ;;  %v1174_v33 = vadd.f32 %v1173_v21, %v1096_v61 }
 0x2b1   : > { %1370 = vadd.xlane.f32.xlu0 %v1369_v55  ;;  %v1373_v32 = vadd.f32 %v1372_v1, %v1295_v44  ;;  %v1767_v23 = vadd.f32 %v1690_v35, %v1689_v63  ;;  %v1494_v0 = vmul.f32 %v2895_v5, %v1006_v31  ;;  %v1296_v11 = vmul.f32 %v2891_v26, %v1008_v50 }
 0x2b2   : > { %v1693_v13 = vmul.f32 %v2904_v18, %v1005_v12  ;;  %v1694_v29 = vmul.f32 %v2906_v40, %v1006_v31  ;;  %v1569_v41 = vadd.f32 %v1568_v42, %v1492_v25  ;;  %v1495_v53 = vmul.f32 %v2900_v10, %v1007_v22 }
 0x2b3   : > { %1175 = vadd.xlane.f32.xlu1 %v1174_v33  ;;  %v1768_v57 = vadd.f32 %v1767_v23, %v1691_v14  ;;  %v1572_v51 = vadd.f32 %v1494_v0, %v1493_v24  ;;  %v1374_v8 = vadd.f32 %v1373_v32, %v1296_v11  ;;  %v1692_v58 = vmul.f32 %v2916_v59, %v3364_v47 }
 0x2b4   : > { %v1772_v7 = vadd.f32 %v1694_v29, %v1693_v13  ;;  %v1496_v26 = vmul.f32 %v2902_v48, %v1008_v50  ;;  %v1695_v18 = vmul.f32 %v2908_v34, %v1007_v22  ;;  %v1696_v10 = vmul.f32 %v2916_v59, %v1008_v50 }
 0x2b5   : > { %1570 = vadd.xlane.f32.xlu0 %v1569_v41  ;;  %v1573_v3 = vadd.f32 %v1572_v51, %v1495_v53  ;;  %v1769_v5 = vadd.f32 %v1768_v57, %v1692_v58  ;;  %v3737_v34 = vlaneseq }
 0x2b6   : > { %v1773_v6 = vadd.f32 %v1772_v7, %v1695_v18 }
 0x2b7   : > { %1375 = vadd.xlane.f32.xlu1 %v1374_v8  ;;  %v1574_v40 = vadd.f32 %v1573_v3, %v1496_v26  ;;  %v3416_v2 = vand.u32 127, %v3737_v34 }
 0x2b8   : > { %v1774_v19 = vadd.f32 %v1773_v6, %v1696_v10 }
 0x2b9   : > { %1770 = vadd.xlane.f32.xlu0 %v1769_v5  ;;  %vm1177_vm1 = vcmp.eq.s32.totalorder %v3416_v2, 0  ;;  %vm1377_vm2 = vcmp.eq.s32.totalorder %v3416_v2, 1  ;;  %vm1577_vm3 = vcmp.eq.s32.totalorder %v3416_v2, 2  ;;  %vm1777_vm4 = vcmp.eq.s32.totalorder %v3416_v2, 3 }
 0x2bb   : > { %1575 = vadd.xlane.f32.xlu1 %v1574_v40 }
 0x2bf   : > { %1775 = vadd.xlane.f32.xlu1 %v1774_v19 }
 0x2c9   : > { %v1101_v28 = vpop.xlane.xlu0 %1100 }
 0x2ca   : > { %2113 = vtanh.f32 %v1101_v28 }
 0x2cd   : > { %v1301_v20 = vpop.xlane.xlu0 %1300  ;;  %v1106_v12 = vpop.xlane.xlu1 %1105 }
 0x2ce   : > { %2115 = vtanh.f32 %v1301_v20 }
 0x2d1   : > { %v1501_v47 = vpop.xlane.xlu0 %1500  ;;  %v1306_v37 = vpop.xlane.xlu1 %1305 }
 0x2d2   : > { %2117 = vtanh.f32 %v1501_v47 }
 0x2d3   : > { %2119 = vtanh.f32 %v1106_v12 }
 0x2d4   : > { %v2114_v62 = vpop.eup %2113 }
 0x2d5   : > { %v1701_v48 = vpop.xlane.xlu0 %1700  ;;  %v1506_v31 = vpop.xlane.xlu1 %1505  ;;  %v1194_v50 = vsel %vm1177_vm1, %v2114_v62, 0.0 }
 0x2d6   : > { %2121 = vtanh.f32 %v1701_v48 }
 0x2d7   : > { %2123 = vtanh.f32 %v1306_v37 }
 0x2d8   : > { %2125 = vtanh.f32 %v1506_v31  ;;  %v2116_v4 = vpop.eup %2115 }
 0x2d9   : > { %v1111_v59 = vpop.xlane.xlu0 %1110  ;;  %v1706_v43 = vpop.xlane.xlu1 %1705  ;;  %v1394_v16 = vsel %vm1377_vm2, %v2116_v4, %v1194_v50 }
 0x2da   : > { %2127 = vtanh.f32 %v1706_v43 }
 0x2db   : > { %2129 = vtanh.f32 %v1111_v59 }
 0x2dc   : > { %v2118_v22 = vpop.eup %2117 }
 0x2dd   : > { %v1311_v45 = vpop.xlane.xlu0 %1310  ;;  %v2120_v38 = vpop.eup %2119  ;;  %v1594_v9 = vsel %vm1577_vm3, %v2118_v22, %v1394_v16 }
 0x2de   : > { %v1116_v15 = vpop.xlane.xlu1 %1115  ;;  %2131 = vtanh.f32 %v1311_v45  ;;  %v1195_v17 = vsel %vm1177_vm1, %v2120_v38, 0.0 }
 0x2e0   : > { %v2122_v27 = vpop.eup %2121 }
 0x2e1   : > { %v2124_v54 = vpop.eup %2123  ;;  %v1794_v52 = vsel %vm1777_vm4, %v2122_v27, %v1594_v9  ;;  %v1511_v36 = vpop.xlane.xlu0 %1510 }
 0x2e2   : > { %v2126_v46 = vpop.eup %2125  ;;  %1810 = vst [vmem:[%s3429_s9] sm:$0xff] %v1794_v52  ;;  %2133 = vtanh.f32 %v1511_v36  ;;  %v1316_v39 = vpop.xlane.xlu1 %1315  ;;  %v1395_v61 = vsel %vm1377_vm2, %v2124_v54, %v1195_v17 }
 0x2e3   : > { %v1595_v56 = vsel %vm1577_vm3, %v2126_v46, %v1395_v61 }
 0x2e4   : > { %v2128_v49 = vpop.eup %2127 }
 0x2e5   : > { %v1711_v55 = vpop.xlane.xlu0 %1710  ;;  %v1795_v21 = vsel %vm1777_vm4, %v2128_v49, %v1595_v56  ;;  %v2130_v44 = vpop.eup %2129 }
 0x2e6   : > { %2135 = vtanh.f32 %v1711_v55  ;;  %1811 = vst [vmem:[%s3429_s9 + $0x8] sm:$0xff] %v1795_v21  ;;  %v1516_v30 = vpop.xlane.xlu1 %1515  ;;  %v1196_v42 = vsel %vm1177_vm1, %v2130_v44, 0.0 }
 0x2e7   : > { %2137 = vtanh.f32 %v1116_v15 }
 0x2e8   : > { %2139 = vtanh.f32 %v1316_v39  ;;  %v2132_v63 = vpop.eup %2131 }
 0x2e9   : > { %2141 = vtanh.f32 %v1516_v30  ;;  %v1121_v60 = vpop.xlane.xlu0 %1120  ;;  %v1396_v14 = vsel %vm1377_vm2, %v2132_v63, %v1196_v42 }
 0x2ea   : > { %v1716_v1 = vpop.xlane.xlu1 %1715 }
 0x2eb   : > { %2143 = vtanh.f32 %v1716_v1 }
 0x2ec   : > { %v2134_v35 = vpop.eup %2133  ;;  %2145 = vtanh.f32 %v1121_v60 }
 0x2ed   : > { %v1321_v25 = vpop.xlane.xlu0 %1320  ;;  %v1596_v33 = vsel %vm1577_vm3, %v2134_v35, %v1396_v14 }
 0x2ee   : > { %2147 = vtanh.f32 %v1321_v25 }
 0x2ef   : > { %v1126_v32 = vpop.xlane.xlu1 %1125 }
 0x2f0   : > { %v2136_v24 = vpop.eup %2135 }
 0x2f1   : > { %v2138_v23 = vpop.eup %2137  ;;  %v1796_v0 = vsel %vm1777_vm4, %v2136_v24, %v1596_v33  ;;  %v1521_v11 = vpop.xlane.xlu0 %1520 }
 0x2f2   : > { %v2140_v13 = vpop.eup %2139  ;;  %1812 = vst [vmem:[%s3429_s9 + $0x10] sm:$0xff] %v1796_v0  ;;  %2149 = vtanh.f32 %v1521_v11  ;;  %v1197_v41 = vsel %vm1177_vm1, %v2138_v23, 0.0 }
 0x2f3   : > { %v2142_v29 = vpop.eup %2141  ;;  %v1326_v57 = vpop.xlane.xlu1 %1325  ;;  %v1397_v53 = vsel %vm1377_vm2, %v2140_v13, %v1197_v41 }
 0x2f4   : > { %v1597_v58 = vsel %vm1577_vm3, %v2142_v29, %v1397_v53 }
 0x2f5   : > { %v1721_v51 = vpop.xlane.xlu0 %1720  ;;  %v2144_v8 = vpop.eup %2143 }
 0x2f6   : > { %2151 = vtanh.f32 %v1721_v51  ;;  %v1797_v3 = vsel %vm1777_vm4, %v2144_v8, %v1597_v58  ;;  %v2146_v5 = vpop.eup %2145 }
 0x2f7   : > { %1813 = vst [vmem:[%s3429_s9 + $0x18] sm:$0xff] %v1797_v3  ;;  %2153 = vtanh.f32 %v1126_v32  ;;  %v1526_v7 = vpop.xlane.xlu1 %1525  ;;  %v1198_v10 = vsel %vm1177_vm1, %v2146_v5, 0.0 }
 0x2f8   : > { %2155 = vtanh.f32 %v1326_v57  ;;  %v2148_v18 = vpop.eup %2147 }
 0x2f9   : > { %2157 = vtanh.f32 %v1526_v7  ;;  %v1398_v19 = vsel %vm1377_vm2, %v2148_v18, %v1198_v10 }
 0x2fa   : > { %v1131_v26 = vpop.xlane.xlu0 %1130 }
 0x2fb   : > { %v1726_v40 = vpop.xlane.xlu1 %1725 }
 0x2fc   : > { %v2150_v6 = vpop.eup %2149  ;;  %2159 = vtanh.f32 %v1726_v40 }
 0x2fd   : > { %v1598_v12 = vsel %vm1577_vm3, %v2150_v6, %v1398_v19  ;;  %2161 = vtanh.f32 %v1131_v26 }
 0x2fe   : > { %v1331_v28 = vpop.xlane.xlu0 %1330 }
 0x2ff   : > { %2163 = vtanh.f32 %v1331_v28 }
 0x300   : > { %v2152_v20 = vpop.eup %2151  ;;  %v1136_v47 = vpop.xlane.xlu1 %1135 }
 0x301   : > { %v1798_v37 = vsel %vm1777_vm4, %v2152_v20, %v1598_v12  ;;  %v2154_v48 = vpop.eup %2153 }
 0x302   : > { %1814 = vst [vmem:[%s3429_s9 + $0x20] sm:$0xff] %v1798_v37  ;;  %v2156_v31 = vpop.eup %2155  ;;  %v1531_v34 = vpop.xlane.xlu0 %1530  ;;  %v1199_v62 = vsel %vm1177_vm1, %v2154_v48, 0.0 }
 0x303   : > { %v2158_v59 = vpop.eup %2157  ;;  %2165 = vtanh.f32 %v1531_v34  ;;  %v1399_v4 = vsel %vm1377_vm2, %v2156_v31, %v1199_v62 }
 0x304   : > { %v1336_v43 = vpop.xlane.xlu1 %1335  ;;  %v1599_v45 = vsel %vm1577_vm3, %v2158_v59, %v1399_v4  ;;  %2167 = vtanh.f32 %v1136_v47 }
 0x306   : > { %v2160_v22 = vpop.eup %2159  ;;  %v1731_v50 = vpop.xlane.xlu0 %1730 }
 0x307   : > { %v1799_v38 = vsel %vm1777_vm4, %v2160_v22, %v1599_v45  ;;  %2169 = vtanh.f32 %v1731_v50  ;;  %v2162_v9 = vpop.eup %2161 }
 0x308   : > { %v1536_v16 = vpop.xlane.xlu1 %1535  ;;  %1815 = vst [vmem:[%s3429_s9 + $0x28] sm:$0xff] %v1799_v38  ;;  %2171 = vtanh.f32 %v1336_v43  ;;  %v1200_v46 = vsel %vm1177_vm1, %v2162_v9, 0.0 }
 0x309   : > { %2173 = vtanh.f32 %v1536_v16  ;;  %v2164_v54 = vpop.eup %2163 }
 0x30a   : > { %v1141_v15 = vpop.xlane.xlu0 %1140  ;;  %v1400_v39 = vsel %vm1377_vm2, %v2164_v54, %v1200_v46 }
 0x30c   : > { %v1736_v27 = vpop.xlane.xlu1 %1735 }
 0x30d   : > { %2175 = vtanh.f32 %v1736_v27  ;;  %v2166_v52 = vpop.eup %2165 }
 0x30e   : > { %v1341_v36 = vpop.xlane.xlu0 %1340  ;;  %v2168_v17 = vpop.eup %2167  ;;  %v1600_v56 = vsel %vm1577_vm3, %v2166_v52, %v1400_v39  ;;  %2177 = vtanh.f32 %v1141_v15 }
 0x30f   : > { %2179 = vtanh.f32 %v1341_v36  ;;  %v1201_v44 = vsel %vm1177_vm1, %v2168_v17, 0.0 }
 0x310   : > { %v1146_v61 = vpop.xlane.xlu1 %1145 }
 0x311   : > { %v2170_v49 = vpop.eup %2169 }
 0x312   : > { %v2172_v55 = vpop.eup %2171  ;;  %v1800_v21 = vsel %vm1777_vm4, %v2170_v49, %v1600_v56  ;;  %v1541_v30 = vpop.xlane.xlu0 %1540 }
 0x313   : > { %v2174_v60 = vpop.eup %2173  ;;  %1816 = vst [vmem:[%s3429_s9 + $0x30] sm:$0xff] %v1800_v21  ;;  %2181 = vtanh.f32 %v1541_v30  ;;  %v1401_v63 = vsel %vm1377_vm2, %v2172_v55, %v1201_v44 }
 0x314   : > { %v1346_v1 = vpop.xlane.xlu1 %1345  ;;  %v1601_v25 = vsel %vm1577_vm3, %v2174_v60, %v1401_v63 }
 0x316   : > { %v1741_v42 = vpop.xlane.xlu0 %1740 }
 0x317   : > { %v2176_v35 = vpop.eup %2175  ;;  %2183 = vtanh.f32 %v1741_v42 }
 0x318   : > { %v1801_v14 = vsel %vm1777_vm4, %v2176_v35, %v1601_v25  ;;  %2185 = vtanh.f32 %v1146_v61  ;;  %v1546_v24 = vpop.xlane.xlu1 %1545  ;;  %v2178_v32 = vpop.eup %2177 }
 0x319   : > { %1817 = vst [vmem:[%s3429_s9 + $0x38] sm:$0xff] %v1801_v14  ;;  %2187 = vtanh.f32 %v1346_v1  ;;  %v2180_v0 = vpop.eup %2179  ;;  %v1202_v29 = vsel %vm1177_vm1, %v2178_v32, 0.0 }
 0x31a   : > { %2189 = vtanh.f32 %v1546_v24  ;;  %v1151_v33 = vpop.xlane.xlu0 %1150  ;;  %v1402_v41 = vsel %vm1377_vm2, %v2180_v0, %v1202_v29 }
 0x31c   : > { %v1746_v23 = vpop.xlane.xlu1 %1745 }
 0x31d   : > { %2191 = vtanh.f32 %v1746_v23  ;;  %v2182_v11 = vpop.eup %2181 }
 0x31e   : > { %v1351_v13 = vpop.xlane.xlu0 %1350  ;;  %v1602_v51 = vsel %vm1577_vm3, %v2182_v11, %v1402_v41  ;;  %2193 = vtanh.f32 %v1151_v33 }
 0x31f   : > { %2195 = vtanh.f32 %v1351_v13 }
 0x320   : > { %v1156_v57 = vpop.xlane.xlu1 %1155 }
 0x321   : > { %v2184_v53 = vpop.eup %2183 }
 0x322   : > { %v2186_v8 = vpop.eup %2185  ;;  %v1802_v58 = vsel %vm1777_vm4, %v2184_v53, %v1602_v51  ;;  %v1551_v3 = vpop.xlane.xlu0 %1550 }
 0x323   : > { %v2188_v7 = vpop.eup %2187  ;;  %1818 = vst [vmem:[%s3429_s9 + $0x40] sm:$0xff] %v1802_v58  ;;  %2197 = vtanh.f32 %v1551_v3  ;;  %v1203_v18 = vsel %vm1177_vm1, %v2186_v8, 0.0 }
 0x324   : > { %v2190_v5 = vpop.eup %2189  ;;  %v1356_v26 = vpop.xlane.xlu1 %1355  ;;  %v1403_v40 = vsel %vm1377_vm2, %v2188_v7, %v1203_v18 }
 0x325   : > { %v1603_v19 = vsel %vm1577_vm3, %v2190_v5, %v1403_v40 }
 0x326   : > { %v1751_v6 = vpop.xlane.xlu0 %1750 }
 0x327   : > { %v2192_v10 = vpop.eup %2191  ;;  %2199 = vtanh.f32 %v1751_v6 }
 0x328   : > { %v1803_v28 = vsel %vm1777_vm4, %v2192_v10, %v1603_v19  ;;  %2201 = vtanh.f32 %v1156_v57  ;;  %v1556_v20 = vpop.xlane.xlu1 %1555  ;;  %v2194_v47 = vpop.eup %2193 }
 0x329   : > { %1819 = vst [vmem:[%s3429_s9 + $0x48] sm:$0xff] %v1803_v28  ;;  %2203 = vtanh.f32 %v1356_v26  ;;  %v2196_v48 = vpop.eup %2195  ;;  %v1204_v59 = vsel %vm1177_vm1, %v2194_v47, 0.0 }
 0x32a   : > { %2205 = vtanh.f32 %v1556_v20  ;;  %v1161_v12 = vpop.xlane.xlu0 %1160  ;;  %v1404_v43 = vsel %vm1377_vm2, %v2196_v48, %v1204_v59 }
 0x32c   : > { %v1756_v37 = vpop.xlane.xlu1 %1755 }
 0x32d   : > { %2207 = vtanh.f32 %v1756_v37  ;;  %v2198_v31 = vpop.eup %2197 }
 0x32e   : > { %v1361_v34 = vpop.xlane.xlu0 %1360  ;;  %v1604_v22 = vsel %vm1577_vm3, %v2198_v31, %v1404_v43  ;;  %2209 = vtanh.f32 %v1161_v12 }
 0x32f   : > { %2211 = vtanh.f32 %v1361_v34 }
 0x330   : > { %v1166_v62 = vpop.xlane.xlu1 %1165 }
 0x331   : > { %v2200_v4 = vpop.eup %2199 }
 0x332   : > { %v2202_v45 = vpop.eup %2201  ;;  %v1804_v50 = vsel %vm1777_vm4, %v2200_v4, %v1604_v22  ;;  %v1561_v38 = vpop.xlane.xlu0 %1560 }
 0x333   : > { %v2204_v16 = vpop.eup %2203  ;;  %1820 = vst [vmem:[%s3429_s9 + $0x50] sm:$0xff] %v1804_v50  ;;  %2213 = vtanh.f32 %v1561_v38  ;;  %v1205_v9 = vsel %vm1177_vm1, %v2202_v45, 0.0 }
 0x334   : > { %v2206_v15 = vpop.eup %2205  ;;  %v1366_v27 = vpop.xlane.xlu1 %1365  ;;  %v1405_v54 = vsel %vm1377_vm2, %v2204_v16, %v1205_v9 }
 0x335   : > { %v1605_v46 = vsel %vm1577_vm3, %v2206_v15, %v1405_v54 }
 0x336   : > { %v1761_v52 = vpop.xlane.xlu0 %1760 }
 0x337   : > { %v2208_v36 = vpop.eup %2207  ;;  %2215 = vtanh.f32 %v1761_v52 }
 0x338   : > { %v1805_v17 = vsel %vm1777_vm4, %v2208_v36, %v1605_v46  ;;  %2217 = vtanh.f32 %v1166_v62  ;;  %v1566_v39 = vpop.xlane.xlu1 %1565  ;;  %v2210_v49 = vpop.eup %2209 }
 0x339   : > { %1821 = vst [vmem:[%s3429_s9 + $0x58] sm:$0xff] %v1805_v17  ;;  %2219 = vtanh.f32 %v1366_v27  ;;  %v2212_v55 = vpop.eup %2211  ;;  %v1206_v60 = vsel %vm1177_vm1, %v2210_v49, 0.0 }
 0x33a   : > { %2221 = vtanh.f32 %v1566_v39  ;;  %v1171_v61 = vpop.xlane.xlu0 %1170  ;;  %v1406_v44 = vsel %vm1377_vm2, %v2212_v55, %v1206_v60 }
 0x33c   : > { %v1766_v56 = vpop.xlane.xlu1 %1765 }
 0x33d   : > { %2223 = vtanh.f32 %v1766_v56  ;;  %v2214_v21 = vpop.eup %2213 }
 0x33e   : > { %v1371_v30 = vpop.xlane.xlu0 %1370  ;;  %v1606_v35 = vsel %vm1577_vm3, %v2214_v21, %v1406_v44  ;;  %2225 = vtanh.f32 %v1171_v61 }
 0x33f   : > { %2227 = vtanh.f32 %v1371_v30 }
 0x340   : > { %v1176_v1 = vpop.xlane.xlu1 %1175 }
 0x341   : > { %v2216_v63 = vpop.eup %2215 }
 0x342   : > { %v2218_v25 = vpop.eup %2217  ;;  %v1806_v42 = vsel %vm1777_vm4, %v2216_v63, %v1606_v35  ;;  %v1571_v14 = vpop.xlane.xlu0 %1570 }
 0x343   : > { %v2220_v24 = vpop.eup %2219  ;;  %1822 = vst [vmem:[%s3429_s9 + $0x60] sm:$0xff] %v1806_v42  ;;  %2229 = vtanh.f32 %v1571_v14  ;;  %v1207_v23 = vsel %vm1177_vm1, %v2218_v25, 0.0 }
 0x344   : > { %v2222_v33 = vpop.eup %2221  ;;  %v1376_v32 = vpop.xlane.xlu1 %1375  ;;  %v1407_v0 = vsel %vm1377_vm2, %v2220_v24, %v1207_v23 }
 0x345   : > { %v1607_v29 = vsel %vm1577_vm3, %v2222_v33, %v1407_v0 }
 0x346   : > { %v1771_v11 = vpop.xlane.xlu0 %1770 }
 0x347   : > { %v2224_v13 = vpop.eup %2223  ;;  %2231 = vtanh.f32 %v1771_v11 }
 0x348   : > { %v1807_v41 = vsel %vm1777_vm4, %v2224_v13, %v1607_v29  ;;  %2233 = vtanh.f32 %v1176_v1  ;;  %v1576_v57 = vpop.xlane.xlu1 %1575  ;;  %v2226_v53 = vpop.eup %2225 }
 0x349   : > { %1823 = vst [vmem:[%s3429_s9 + $0x68] sm:$0xff] %v1807_v41  ;;  %2235 = vtanh.f32 %v1376_v32  ;;  %v2228_v8 = vpop.eup %2227  ;;  %v1208_v3 = vsel %vm1177_vm1, %v2226_v53, 0.0 }
 0x34a   : > { %2237 = vtanh.f32 %v1576_v57  ;;  %v1408_v7 = vsel %vm1377_vm2, %v2228_v8, %v1208_v3 }
 0x34c   : > { %v1776_v51 = vpop.xlane.xlu1 %1775 }
 0x34d   : > { %2239 = vtanh.f32 %v1776_v51  ;;  %v2230_v58 = vpop.eup %2229 }
 0x34e   : > { %v1608_v26 = vsel %vm1577_vm3, %v2230_v58, %v1408_v7 }
 0x351   : > { %v2232_v5 = vpop.eup %2231 }
 0x352   : > { %v2234_v18 = vpop.eup %2233  ;;  %v1808_v40 = vsel %vm1777_vm4, %v2232_v5, %v1608_v26 }
 0x353   : > { %v2236_v6 = vpop.eup %2235  ;;  %1824 = vst [vmem:[%s3429_s9 + $0x70] sm:$0xff] %v1808_v40  ;;  %v1209_v19 = vsel %vm1177_vm1, %v2234_v18, 0.0 }
 0x354   : > { %v2238_v10 = vpop.eup %2237  ;;  %v1409_v28 = vsel %vm1377_vm2, %v2236_v6, %v1209_v19 }
 0x355   : > { %v1609_v12 = vsel %vm1577_vm3, %v2238_v10, %v1409_v28 }
 0x357   : > { %v2240_v20 = vpop.eup %2239 }
 0x358   : > { %v1809_v47 = vsel %vm1777_vm4, %v2240_v20, %v1609_v12 }
 0x359   : > { %1825 = vst [vmem:[%s3429_s9 + $0x78] sm:$0xff] %v1809_v47 }
 0x35a PF: > { %s13_s12 = sadd.s32 1, %s2247_s12  }
 0x35b   : > { %p10_p4 = scmp.ge.s32.totalorder %s13_s12, 4  }
 0x35d   :  { %12 = sbr.rel (!%p10_p4) target bundleno = 1 (0x1), region = 65 }

</bundles_post_ra>
